<compile_context>
chip_gen: v7x
topology: tpu7x:2x2x1
jax: 0.10.0
libtpu: 0.0.40
codegen_flags: <defaults>
</compile_context>

<pallas_src>
import functools
import math

import jax
import jax.numpy as jnp
from jax.experimental import pallas as pl
from jax.experimental.pallas import tpu as pltpu


def _round_up(x, m):
    return ((x + m - 1) // m) * m


def _vmem_budget_bytes():
    """Generation-aware VMEM budget: v7x has 64 MiB/TC, v5e/v6e have 128 MiB."""
    try:
        kind = jax.devices()[0].device_kind.lower()
    except Exception:
        kind = ""
    if "v7" in kind:
        return 48 << 20
    if ("v5" in kind) or ("v6" in kind):
        return 96 << 20
    return 48 << 20  # unknown chip: conservative


# ----------------------------- kernels --------------------------------------


def _mlp_kernel_resident(x_ref, w1_ref, b1_ref, w2_ref, b2_ref, o_ref):
    """Full bf16 weights resident in VMEM: fused fc1 -> GELU -> fc2 per row tile."""
    x = x_ref[...].astype(jnp.bfloat16)  # in-kernel cast: single HBM read of x
    h = jnp.dot(x, w1_ref[...], preferred_element_type=jnp.float32)
    h = h + b1_ref[...]
    # tanh-approx GELU -> EUP slot (near-free filler); dropout (eval) = identity
    h = jax.nn.gelu(h, approximate=True)
    out = jnp.dot(h.astype(jnp.bfloat16), w2_ref[...],
                  preferred_element_type=jnp.float32)
    o_ref[...] = (out + b2_ref[...]).astype(o_ref.dtype)


def _mlp_kernel_tiled(x_ref, w1_ref, b1_ref, w2_ref, b2_ref, o_ref):
    """Hidden dim tiled (reduction axis innermost).  The output block index is
    constant in k, so o_ref stays VMEM-resident and doubles as the f32
    accumulator (no scratch, no epilogue copy)."""
    k = pl.program_id(1)
    x = x_ref[...].astype(jnp.bfloat16)
    h = jnp.dot(x, w1_ref[...], preferred_element_type=jnp.float32)
    h = h + b1_ref[...]
    h = jax.nn.gelu(h, approximate=True)          # dropout (eval) = identity
    part = jnp.dot(h.astype(jnp.bfloat16), w2_ref[...],
                   preferred_element_type=jnp.float32)

    @pl.when(k == 0)
    def _():
        o_ref[...] = part + b2_ref[...]

    @pl.when(k > 0)
    def _():
        o_ref[...] += part


# ----------------------------- wrapper ---------------------------------------


def pack_mlp_params(w1, b1, w2, b2):
    """Pad to 128-lane multiples and cast weights to bf16 ONCE (outside the
    per-call path).  w1: (Din, H), b1: (H,), w2: (H, Din), b2: (Din,).
    Zero padding is exact for this MLP (padded hidden units get bias 0,
    GELU(0)=0, and padded output columns are sliced away)."""
    Din, H = w1.shape
    Dp, Hp = _round_up(Din, 128), _round_up(H, 128)
    w1p = jnp.pad(w1, ((0, Dp - Din), (0, Hp - H))).astype(jnp.bfloat16)
    w2p = jnp.pad(w2, ((0, Hp - H), (0, Dp - Din))).astype(jnp.bfloat16)
    b1p = jnp.pad(b1.astype(jnp.float32), (0, Hp - H)).reshape(1, Hp)
    b2p = jnp.pad(b2.astype(jnp.float32), (0, Dp - Din)).reshape(1, Dp)
    return w1p, b1p, w2p, b2p


@functools.partial(jax.jit, static_argnames=("block_m", "block_h"))
def mlp_forward(x, w1p, b1p, w2p, b2p, *, block_m=512, block_h=1024):
    """x: (B, S, Din).  Packed params from pack_mlp_params (bf16 weights,
    f32 biases, 128-padded)."""
    B, S, Din = x.shape
    M = B * S
    Dp, Hp = w1p.shape
    xb = jnp.dtype(x.dtype).itemsize
    budget = _vmem_budget_bytes()

    # ---- row tiling: large tiles, but keep >= 2 row tiles when M allows so
    # the "parallel" M axis shards across both v7x TensorCores.
    tm = max(8, (int(block_m) // 8) * 8)
    while tm > 128 and _round_up(M, tm) // tm < 2:
        tm //= 2
    if M < 128:
        tm = _round_up(M, 8)
    tm = max(8, (tm // 8) * 8)
    Mp = _round_up(M, tm)

    # ---- VMEM estimates (double-buffered tiles + intermediate headroom)
    def est_resident(tm_):
        return (2 * tm_ * Dp * xb           # x tiles (original dtype)
                + 2 * Dp * Hp * 2           # w1 bf16
                + 2 * Hp * Dp * 2           # w2 bf16
                + 2 * 8 * Hp * 4            # b1 (sublane-padded)
                + 2 * 8 * Dp * 4            # b2
                + 2 * tm_ * Dp * 4          # out tiles
                + 2 * tm_ * Hp * 4)         # intermediate h (f32 + bf16 copy)

    def est_tiled(tm_, tH_):
        return (2 * tm_ * Dp * xb
                + 2 * Dp * tH_ * 2
                + 2 * tH_ * Dp * 2
                + 2 * 8 * tH_ * 4
                + 2 * 8 * Dp * 4
                + 2 * tm_ * Dp * 4
                + 2 * tm_ * tH_ * 4)

    weights_resident = est_resident(tm) <= budget

    # ---- x: pad only if needed, keep original dtype (cast to bf16 in-kernel)
    x2d = x.reshape(M, Din)
    if Mp != M or Dp != Din:
        x2d = jnp.pad(x2d, ((0, Mp - M), (0, Dp - Din)))

    cost = pl.CostEstimate(
        flops=4 * Mp * Dp * Hp,                  # two matmuls
        transcendentals=Mp * Hp,                 # tanh per hidden activation
        bytes_accessed=(Mp * Dp * xb + Dp * Hp * 2 + Hp * Dp * 2
                        + Hp * 4 + Dp * 4 + Mp * Dp * 4),
    )

    if weights_resident:
        vmem_limit = min(int(1.2 * est_resident(tm)) + (4 << 20), budget)
        out2d = pl.pallas_call(
            _mlp_kernel_resident,
            out_shape=jax.ShapeDtypeStruct((Mp, Dp), x.dtype),
            grid_spec=pltpu.PrefetchScalarGridSpec(
                num_scalar_prefetch=0,
                grid=(Mp // tm,),
                in_specs=[
                    pl.BlockSpec((tm, Dp), lambda i: (i, 0)),   # x row tile
                    pl.BlockSpec((Dp, Hp), lambda i: (0, 0)),   # w1 (whole, fetched once)
                    pl.BlockSpec((1, Hp), lambda i: (0, 0)),    # b1
                    pl.BlockSpec((Hp, Dp), lambda i: (0, 0)),   # w2 (whole)
                    pl.BlockSpec((1, Dp), lambda i: (0, 0)),    # b2
                ],
                out_specs=pl.BlockSpec((tm, Dp), lambda i: (i, 0)),
            ),
            compiler_params=pltpu.CompilerParams(
                dimension_semantics=("parallel",),
                vmem_limit_bytes=vmem_limit,
            ),
            cost_estimate=cost,
        )(x2d, w1p, b1p, w2p, b2p)
    else:
        # ---- hidden tiling: largest 128-multiple divisor of Hp within budget
        tH = min(max(_round_up(int(block_h), 128), 128), Hp)
        while Hp % tH != 0:
            tH -= 128
        while tH > 128 and est_tiled(tm, tH) > budget:
            tH -= 128
            while Hp % tH != 0:
                tH -= 128
        vmem_limit = min(int(1.2 * est_tiled(tm, tH)) + (4 << 20), budget)
        out2d = pl.pallas_call(
            _mlp_kernel_tiled,
            out_shape=jax.ShapeDtypeStruct((Mp, Dp), jnp.float32),  # also the accumulator
            grid_spec=pltpu.PrefetchScalarGridSpec(
                num_scalar_prefetch=0,
                grid=(Mp // tm, Hp // tH),
                in_specs=[
                    pl.BlockSpec((tm, Dp), lambda i, k: (i, 0)),   # x row tile
                    pl.BlockSpec((Dp, tH), lambda i, k: (0, k)),   # w1 hidden slab
                    pl.BlockSpec((1, tH), lambda i, k: (0, k)),    # b1 hidden slab
                    pl.BlockSpec((tH, Dp), lambda i, k: (k, 0)),   # w2 hidden slab
                    pl.BlockSpec((1, Dp), lambda i, k: (0, 0)),    # b2
                ],
                out_specs=pl.BlockSpec((tm, Dp), lambda i, k: (i, 0)),
            ),
            compiler_params=pltpu.CompilerParams(
                dimension_semantics=("parallel", "arbitrary"),
                vmem_limit_bytes=vmem_limit,
            ),
            cost_estimate=cost,
        )(x2d, w1p, b1p, w2p, b2p)

    if Mp != M or Dp != Din:
        out2d = out2d[:M, :Din]
    out2d = out2d.astype(x.dtype)
    return out2d.reshape(B, S, Din)


def init_mlp_params(key, in_features, hidden_features, dtype=jnp.float32):
    """Deterministic init mirroring nn.Linear default (uniform +/- 1/sqrt(fan_in)).
    Weights stored as (in, out): transpose of torch's (out, in)."""
    k1, k2, k3, k4 = jax.random.split(key, 4)
    bound1 = 1.0 / math.sqrt(in_features)
    bound2 = 1.0 / math.sqrt(hidden_features)
    w1 = jax.random.uniform(k1, (in_features, hidden_features), dtype,
                            minval=-bound1, maxval=bound1)
    b1 = jax.random.uniform(k2, (hidden_features,), dtype,
                            minval=-bound1, maxval=bound1)
    w2 = jax.random.uniform(k3, (hidden_features, in_features), dtype,
                            minval=-bound2, maxval=bound2)
    b2 = jax.random.uniform(k4, (in_features,), dtype,
                            minval=-bound2, maxval=bound2)
    return w1, b1, w2, b2


if __name__ == "__main__":
    key = jax.random.PRNGKey(0)
    k_x, k_p = jax.random.split(key)

    # M = 144 (exercises row-tile padding and a >1 "parallel" grid axis).
    B, S = 2, 72
    in_features = 128
    hidden_features = 512

    x = jax.random.normal(k_x, (B, S, in_features), dtype=jnp.float32)
    w1, b1, w2, b2 = init_mlp_params(k_p, in_features, hidden_features)

    # Pack (pad + bf16 cast) once, outside the per-call path.
    w1p, b1p, w2p, b2p = pack_mlp_params(w1, b1, w2, b2)

    out = mlp_forward(x, w1p, b1p, w2p, b2p)
    jax.block_until_ready(out)

    # Reference in plain JAX f32 with exact (erf) GELU, matching nn.GELU()'s
    # default and eval-mode dropout = identity.  Kernel uses bf16 MXU operands
    # + tanh-approx GELU -> slightly looser tolerance.
    h_ref = jax.nn.gelu(x @ w1 + b1, approximate=False)
    ref = h_ref @ w2 + b2
    assert out.shape == (B, S, in_features)
    max_err = float(jnp.max(jnp.abs(out - ref)))
    assert jnp.allclose(out, ref, atol=3e-2, rtol=3e-2), max_err

    print("KERNEL_OK")
</pallas_src>

<mosaic_0001>
module attributes {stable_mosaic.version = 11 : i64} {
  func.func @_mlp_kernel_resident(%arg0: i32, %arg1: memref<128x128xf32, #tpu.memory_space<vmem>>, %arg2: memref<128x512xbf16, #tpu.memory_space<vmem>>, %arg3: memref<1x512xf32, #tpu.memory_space<vmem>>, %arg4: memref<512x128xbf16, #tpu.memory_space<vmem>>, %arg5: memref<1x128xf32, #tpu.memory_space<vmem>>, %arg6: memref<128x128xf32, #tpu.memory_space<vmem>>) attributes {dimension_semantics = [#tpu.dimension_semantics<parallel>], iteration_bounds = array<i64: 2>, scalar_prefetch = 0 : i64, scratch_operands = 0 : i64, tpu.core_type = #tpu.core_type<tc>, window_params = [{transform_indices = @transform_0, window_bounds = array<i64: 128, 128>}, {pipeline_mode = #tpu.pipeline_mode<synchronous>, transform_indices = @transform_1, window_bounds = array<i64: 128, 512>}, {pipeline_mode = #tpu.pipeline_mode<synchronous>, transform_indices = @transform_2, window_bounds = array<i64: 1, 512>}, {pipeline_mode = #tpu.pipeline_mode<synchronous>, transform_indices = @transform_3, window_bounds = array<i64: 512, 128>}, {pipeline_mode = #tpu.pipeline_mode<synchronous>, transform_indices = @transform_4, window_bounds = array<i64: 1, 128>}, {transform_indices = @transform_5, window_bounds = array<i64: 128, 128>}]} {
    %c0 = arith.constant 0 : index
    %c0_0 = arith.constant 0 : index
    %0 = vector.load %arg1[%c0, %c0_0] : memref<128x128xf32, #tpu.memory_space<vmem>>, vector<128x128xf32>
    %1 = arith.truncf %0 : vector<128x128xf32> to vector<128x128xbf16>
    %c0_1 = arith.constant 0 : index
    %c0_2 = arith.constant 0 : index
    %2 = vector.load %arg2[%c0_1, %c0_2] : memref<128x512xbf16, #tpu.memory_space<vmem>>, vector<128x512xbf16>
    %cst = arith.constant dense<0.000000e+00> : vector<128x512xf32>
    %3 = tpu.matmul %1, %2, %cst {dimension_numbers = #tpu.dot_dimension_numbers<[1], [0], [0], [1], [0, 0, 1, 1], [], []>} : vector<128x128xbf16>, vector<128x512xbf16>, vector<128x512xf32> -> vector<128x512xf32>
    %c0_3 = arith.constant 0 : index
    %c0_4 = arith.constant 0 : index
    %4 = vector.load %arg3[%c0_3, %c0_4] : memref<1x512xf32, #tpu.memory_space<vmem>>, vector<1x512xf32>
    %5 = vector.broadcast %4 : vector<1x512xf32> to vector<128x512xf32>
    %6 = arith.addf %3, %5 : vector<128x512xf32>
    %7 = arith.mulf %6, %6 : vector<128x512xf32>
    %8 = arith.mulf %6, %7 : vector<128x512xf32>
    %cst_5 = arith.constant 4.471500e-02 : f32
    %9 = vector.broadcast %cst_5 : f32 to vector<128x512xf32>
    %10 = arith.mulf %9, %8 : vector<128x512xf32>
    %11 = arith.addf %6, %10 : vector<128x512xf32>
    %cst_6 = arith.constant 0.797884583 : f32
    %12 = vector.broadcast %cst_6 : f32 to vector<128x512xf32>
    %13 = arith.mulf %12, %11 : vector<128x512xf32>
    %14 = math.tanh %13 : vector<128x512xf32>
    %cst_7 = arith.constant 1.000000e+00 : f32
    %15 = vector.broadcast %cst_7 : f32 to vector<128x512xf32>
    %16 = arith.addf %15, %14 : vector<128x512xf32>
    %cst_8 = arith.constant 5.000000e-01 : f32
    %17 = vector.broadcast %cst_8 : f32 to vector<128x512xf32>
    %18 = arith.mulf %17, %16 : vector<128x512xf32>
    %19 = arith.mulf %6, %18 : vector<128x512xf32>
    %20 = arith.truncf %19 : vector<128x512xf32> to vector<128x512xbf16>
    %c0_9 = arith.constant 0 : index
    %c0_10 = arith.constant 0 : index
    %21 = vector.load %arg4[%c0_9, %c0_10] : memref<512x128xbf16, #tpu.memory_space<vmem>>, vector<512x128xbf16>
    %cst_11 = arith.constant dense<0.000000e+00> : vector<128x128xf32>
    %22 = tpu.matmul %20, %21, %cst_11 {dimension_numbers = #tpu.dot_dimension_numbers<[1], [0], [0], [1], [0, 0, 1, 1], [], []>} : vector<128x512xbf16>, vector<512x128xbf16>, vector<128x128xf32> -> vector<128x128xf32>
    %c0_12 = arith.constant 0 : index
    %c0_13 = arith.constant 0 : index
    %23 = vector.load %arg5[%c0_12, %c0_13] : memref<1x128xf32, #tpu.memory_space<vmem>>, vector<1x128xf32>
    %24 = vector.broadcast %23 : vector<1x128xf32> to vector<128x128xf32>
    %25 = arith.addf %22, %24 : vector<128x128xf32>
    %c0_14 = arith.constant 0 : index
    %c0_15 = arith.constant 0 : index
    %26 = vector.load %arg6[%c0_14, %c0_15] : memref<128x128xf32, #tpu.memory_space<vmem>>, vector<128x128xf32>
    tpu.vector_store %arg6[%c0_14, %c0_15], %25 {strides = array<i32>} : memref<128x128xf32, #tpu.memory_space<vmem>>, vector<128x128xf32>,
    return
  }
  func.func @transform_0(%arg0: i32) -> (i32, i32) {
    %c0_i32 = arith.constant 0 : i32
    %c0_i32_0 = arith.constant 0 : i32
    return %arg0, %c0_i32 : i32, i32
  }
  func.func @transform_1(%arg0: i32) -> (i32, i32) {
    %c0_i32 = arith.constant 0 : i32
    %c0_i32_0 = arith.constant 0 : i32
    %c0_i32_1 = arith.constant 0 : i32
    return %c0_i32, %c0_i32_0 : i32, i32
  }
  func.func @transform_2(%arg0: i32) -> (i32, i32) {
    %c0_i32 = arith.constant 0 : i32
    %c0_i32_0 = arith.constant 0 : i32
    %c0_i32_1 = arith.constant 0 : i32
    return %c0_i32, %c0_i32_0 : i32, i32
  }
  func.func @transform_3(%arg0: i32) -> (i32, i32) {
    %c0_i32 = arith.constant 0 : i32
    %c0_i32_0 = arith.constant 0 : i32
    %c0_i32_1 = arith.constant 0 : i32
    return %c0_i32, %c0_i32_0 : i32, i32
  }
  func.func @transform_4(%arg0: i32) -> (i32, i32) {
    %c0_i32 = arith.constant 0 : i32
    %c0_i32_0 = arith.constant 0 : i32
    %c0_i32_1 = arith.constant 0 : i32
    return %c0_i32, %c0_i32_0 : i32, i32
  }
  func.func @transform_5(%arg0: i32) -> (i32, i32) {
    %c0_i32 = arith.constant 0 : i32
    %c0_i32_0 = arith.constant 0 : i32
    return %arg0, %c0_i32 : i32, i32
  }
}

</mosaic_0001>

<bundles_post_ra>
// kernel: mlp_forward.1
= control target key start
LH: loop header
LB: loop body
LE: loop exit
PB: predicated region body
PF: predicated region fallthrough
CT: control target
= control target key end

     0   :  { %10 = vsyncpa [#allocation3], 0  ;;  %s2367_s18 = smov 0   ;;  %s3467_s0 = inlined_call_operand.vmem [shape: f32[256,128], index: 0, kind: input, shape index: {}]   ;;  %s3468_s1 = inlined_call_operand.vmem [shape: bf16[128,512], index: 1, kind: input, shape index: {}]   ;;  %s3469_s2 = inlined_call_operand.vmem [shape: f32[1,512], index: 2, kind: input, shape index: {}]   ;;  %s3470_s3 = inlined_call_operand.hbm [shape: bf16[512,128], index: 3, kind: input, shape index: {}]   ;;  %s3471_s4 = inlined_call_operand.vmem [shape: f32[1,128], index: 4, kind: input, shape index: {}]   ;;  %s3472_s5 = inlined_call_operand.vmem [shape: f32[256,128], index: 5, kind: output, shape index: {}]  }
   0x1 LB: > { %s1857_s19 = sadd.s32 4294967295, %s2331_s18   ;;  %p1859_p0 = scmp.ge.s32.totalorder %s2331_s18, 1  ;;  %s2331_s18 = sphi %s2367_s18, %s16_s18  }
   0x2   : > { %p157_p1 = scmp.lt.s32.totalorder %s2331_s18, 3  ;;  %s2333_s20 = smov [#allocation2]  }
   0x3   : > { %s175_s21 = sshll.u32 %s2333_s20, 4  ;;  %p2381_p3 = scmp.eq.s32.totalorder %s1857_s19, 0  ;;  %s176_s21 = int_to_ptr.vmem [resolvable:$true] %s175_s21 }
   0x4   : > { %p2375_p2 = pnand %p1859_p0, %p157_p1  ;;  %s2293_s27 = scalar_lea.hbm %s3470_s3, 4096 }
   0x5   : > { %s3516_s23 = scalar_select %p2381_p3, 1, 0 }
   0x6   : > { %s3515_s22 = scalar_select %p2375_p2, 1, 0 }
   0x7   : > { %p2067_p4 = pneg %p2375_p2  ;;  %p2294_p6 = scmp.ne.s32.totalorder %s3470_s3, %s2293_s27 }
   0x8   : > { %p2300_p10 = scmp.lt.u32.totalorder %s2293_s27, %s3470_s3 }
   0x9   : > { %p2389_p5 = pnand %p2381_p3, %p2067_p4 }
   0xb   : > { %p2295_p7 = pneg %p2389_p5 }
   0xd   : > { %p2296_p8 = pnand %p2295_p7, %p2294_p6 }
   0xf   : > { %p2297_p9 = pneg %p2296_p8 }
  0x11   : > { %p2302_p11 = pnand %p2300_p10, %p2297_p9 }
  0x13   : > { %2305 = shalt.err (!%p2302_p11)
}
  0x14   : > { %s2306_s7 = scalar_lea.vmem %s176_s21, 4096  ;;  %p2314_p1 = scmp.lt.s32.totalorder %s176_s21, %s176_s21 }
  0x15   : > { %p2307_p12 = scmp.ne.s32.totalorder %s176_s21, %s2306_s7  ;;  %p2315_p4 = scmp.lt.s32.totalorder %s2306_s7, %s2306_s7 }
  0x17   : > { %p2309_p13 = pnand %p2307_p12, %p2295_p7  ;;  %p2316_p3 = por %p2315_p4, %p2314_p1 }
  0x19   : > { %p2310_p0 = pneg %p2309_p13 }
  0x1b   : > { %p2317_p2 = pnand %p2316_p3, %p2310_p0 }
  0x1d   : > { %2320 = shalt.err (!%p2317_p2)
}
  0x1e   : > { %s2334_s8 = smov 64   ;;  %s2335_s9 = smov 4  }
  0x1f   : > { %2070 = dma.hbm_to_vmem [thread:$0]  (!%p2389_p5), %s3470_s3, 4096, %s176_s21, [#allocation3], %s2334_s8, %s2334_s8, %s2335_s9  }
  0x20   : > { %p3518_p6 = scmp.ne.s32.totalorder %s3515_s22, 0 }
  0x22   : > { %203 = sbr.rel (%p3518_p6) target bundleno = 691 (0x2b3), region = 40 }
  0x29   : > { %p3519_p8 = scmp.ne.s32.totalorder %s3516_s23, 0 }
  0x2b   : > { %2326 = dma.done.wait (%p3519_p8), [#allocation3], 4096  }
  0x2c   : > { %2328 = vsyncadd (%p3519_p8), [#allocation3], 4294963200  ;;  %v2336_v0 = vmov 0   ;;  %v2085_v1 = vld [vmem:[%s3468_s1 + $0x4] ss:$16 sps:$4 sm:$0xff]   ;;  %s1864_s17 = sshll.u32 %s1857_s19, 4 }
  0x2d   : > { %514 = vmatprep.mubr.bf16.mxu0 %v2336_v0  ;;  %627 = vmatprep.mubr.bf16.mxu1 %v2336_v0  ;;  %v2087_v2 = vld [vmem:[%s3468_s1 + $0xc] ss:$16 sps:$4 sm:$0xff]   ;;  %v2089_v3 = vld [vmem:[%s3468_s1] ss:$16 sps:$4 sm:$0xff]   ;;  %v2090_v4 = vld [vmem:[%s3468_s1 + $0x8] ss:$16 sps:$4 sm:$0xff]  }
  0x2e   : > { %482 = vmatprep.subr.bf16.mxu0 %v2085_v1  ;;  %595 = vmatprep.subr.bf16.mxu1 %v2087_v2  ;;  %v2091_v5 = vld [vmem:[%s3468_s1 + $0x24] ss:$16 sps:$4 sm:$0xff]   ;;  %v2093_v6 = vld [vmem:[%s3468_s1 + $0x2c] ss:$16 sps:$4 sm:$0xff]   ;;  %v2095_v7 = vld [vmem:[%s3468_s1 + $0x20] ss:$16 sps:$4 sm:$0xff]  }
  0x2f   : > { %483 = vmatpush1.bf16.msra.mxu0 %v2089_v3  ;;  %596 = vmatpush1.bf16.msra.mxu1 %v2090_v4  ;;  %v2096_v8 = vld [vmem:[%s3468_s1 + $0x28] ss:$16 sps:$4 sm:$0xff]   ;;  %v2097_v9 = vld [vmem:[%s3468_s1 + $0x44] ss:$16 sps:$4 sm:$0xff]   ;;  %v2099_v10 = vld [vmem:[%s3468_s1 + $0x4c] ss:$16 sps:$4 sm:$0xff]  }
  0x30   : > { %484 = vmatprep.subr.bf16.mxu0 %v2091_v5  ;;  %597 = vmatprep.subr.bf16.mxu1 %v2093_v6  ;;  %v2101_v11 = vld [vmem:[%s3468_s1 + $0x40] ss:$16 sps:$4 sm:$0xff]   ;;  %v2102_v12 = vld [vmem:[%s3468_s1 + $0x48] ss:$16 sps:$4 sm:$0xff]   ;;  %v2103_v13 = vld [vmem:[%s3468_s1 + $0x64] ss:$16 sps:$4 sm:$0xff]  }
  0x31   : > { %v2105_v14 = vld [vmem:[%s3468_s1 + $0x6c] ss:$16 sps:$4 sm:$0xff]   ;;  %v2107_v15 = vld [vmem:[%s3468_s1 + $0x60] ss:$16 sps:$4 sm:$0xff]   ;;  %v2108_v16 = vld [vmem:[%s3468_s1 + $0x68] ss:$16 sps:$4 sm:$0xff]  }
  0x32   : > { %v2109_v17 = vld [vmem:[%s3468_s1 + $0x84] ss:$16 sps:$4 sm:$0xff]   ;;  %p232_p2 = scmp.lt.s32.totalorder %s1864_s17, 31  ;;  %v2111_v18 = vld [vmem:[%s3468_s1 + $0x8c] ss:$16 sps:$4 sm:$0xff]  }
  0x33   : > { %485 = vmatpush1.bf16.msra.mxu0 %v2095_v7  ;;  %598 = vmatpush1.bf16.msra.mxu1 %v2096_v8  ;;  %v2113_v19 = vld [vmem:[%s3468_s1 + $0x80] ss:$16 sps:$4 sm:$0xff]   ;;  %v2114_v20 = vld [vmem:[%s3468_s1 + $0x88] ss:$16 sps:$4 sm:$0xff]   ;;  %v2115_v21 = vld [vmem:[%s3468_s1 + $0xa4] ss:$16 sps:$4 sm:$0xff]  }
  0x34   : > { %486 = vmatprep.subr.bf16.mxu0 %v2097_v9  ;;  %599 = vmatprep.subr.bf16.mxu1 %v2099_v10  ;;  %s3645_s17 = smov (!%p232_p2, %s1864_s17), 31  ;;  %v2117_v22 = vld [vmem:[%s3468_s1 + $0xac] ss:$16 sps:$4 sm:$0xff]   ;;  %v2119_v23 = vld [vmem:[%s3468_s1 + $0xa0] ss:$16 sps:$4 sm:$0xff]  }
  0x35   : > { %v2120_v24 = vld [vmem:[%s3468_s1 + $0xa8] ss:$16 sps:$4 sm:$0xff]   ;;  %s1865_s14 = sshll.u32 %s3645_s17, 3  ;;  %v2121_v25 = vld [vmem:[%s3468_s1 + $0xc4] ss:$16 sps:$4 sm:$0xff]  }
  0x36   : > { %v2123_v26 = vld [vmem:[%s3468_s1 + $0xcc] ss:$16 sps:$4 sm:$0xff]   ;;  %s2505_s24 = scalar_lea.vmem %s3467_s0, %s1865_s14  ;;  %v2125_v27 = vld [vmem:[%s3468_s1 + $0xc0] ss:$16 sps:$4 sm:$0xff]   ;;  %v2126_v28 = vld [vmem:[%s3468_s1 + $0xc8] ss:$16 sps:$4 sm:$0xff]   ;;  %s3432_s21 = scalar_lea.vmem %s3472_s5, %s1865_s14 }
  0x37   : > { %487 = vmatpush1.bf16.msra.mxu0 %v2101_v11  ;;  %600 = vmatpush1.bf16.msra.mxu1 %v2102_v12  ;;  %v2127_v29 = vld [vmem:[%s3468_s1 + $0xe4] ss:$16 sps:$4 sm:$0xff]   ;;  %v2129_v30 = vld [vmem:[%s3468_s1 + $0xec] ss:$16 sps:$4 sm:$0xff]   ;;  %v2131_v31 = vld [vmem:[%s3468_s1 + $0xe0] ss:$16 sps:$4 sm:$0xff]  }
  0x38   : > { %488 = vmatprep.subr.bf16.mxu0 %v2103_v13  ;;  %601 = vmatprep.subr.bf16.mxu1 %v2105_v14  ;;  %v2132_v32 = vld [vmem:[%s3468_s1 + $0xe8] ss:$16 sps:$4 sm:$0xff]   ;;  %v244_v33 = vld [vmem:[%s2505_s24] sm:$0xff]  ;;  %v246_v41 = vld [vmem:[%s2505_s24 + $0x10] sm:$0xff] }
  0x39   : > { %v245_v34 = vld [vmem:[%s2505_s24 + $0x8] sm:$0xff]  ;;  %v2133_v35 = vld [vmem:[#allocation2 + $0x40] sm:$0xff]   ;;  %v247_v42 = vld [vmem:[%s2505_s24 + $0x18] sm:$0xff] }
  0x3a   : > { %v2135_v36 = vld [vmem:[#allocation2 + $0xc0] sm:$0xff]   ;;  %v260_v37 = vpack.c.bf16 %v245_v34, %v244_v33  ;;  %v2137_v40 = vld [vmem:[#allocation2 + $0x48] sm:$0xff]   ;;  %v2141_v46 = vld [vmem:[#allocation2 + $0x50] sm:$0xff]   ;;  %v261_v48 = vpack.c.bf16 %v247_v42, %v246_v41 }
  0x3b   : > { %489 = vmatpush1.bf16.msra.mxu0 %v2107_v15  ;;  %602 = vmatpush1.bf16.msra.mxu1 %v2108_v16  ;;  %v2134_v38 = vld [vmem:[#allocation2] sm:$0xff]   ;;  %v2139_v43 = vld [vmem:[#allocation2 + $0xc8] sm:$0xff]   ;;  %v2143_v47 = vld [vmem:[#allocation2 + $0xd0] sm:$0xff]  }
  0x3c   : > { %490 = vmatprep.subr.bf16.mxu0 %v2109_v17  ;;  %603 = vmatprep.subr.bf16.mxu1 %v2111_v18  ;;  %v2136_v39 = vld [vmem:[#allocation2 + $0x80] sm:$0xff]   ;;  %v2138_v44 = vld [vmem:[#allocation2 + $0x8] sm:$0xff]   ;;  %v2142_v49 = vld [vmem:[#allocation2 + $0x10] sm:$0xff]  }
  0x3d   : > { %v2140_v45 = vld [vmem:[#allocation2 + $0x88] sm:$0xff]   ;;  %v2144_v50 = vld [vmem:[#allocation2 + $0x90] sm:$0xff]   ;;  %v248_v51 = vld [vmem:[%s2505_s24 + $0x20] sm:$0xff] }
  0x3e   : > { %v249_v52 = vld [vmem:[%s2505_s24 + $0x28] sm:$0xff]  ;;  %v2145_v53 = vld [vmem:[#allocation2 + $0x58] sm:$0xff]   ;;  %v250_v58 = vld [vmem:[%s2505_s24 + $0x30] sm:$0xff] }
  0x3f   : > { %491 = vmatpush1.bf16.msra.mxu0 %v2113_v19  ;;  %604 = vmatpush1.bf16.msra.mxu1 %v2114_v20  ;;  %v2147_v54 = vld [vmem:[#allocation2 + $0xd8] sm:$0xff]   ;;  %v262_v57 = vpack.c.bf16 %v249_v52, %v248_v51  ;;  %v252_v61 = vld [vmem:[%s2505_s24 + $0x40] sm:$0xff]  ;;  %v253_v62 = vld [vmem:[%s2505_s24 + $0x48] sm:$0xff] }
  0x40   : > { %492 = vmatprep.subr.bf16.mxu0 %v2115_v21  ;;  %605 = vmatprep.subr.bf16.mxu1 %v2117_v22  ;;  %v2146_v55 = vld [vmem:[#allocation2 + $0x18] sm:$0xff]   ;;  %v264_v63 = vpack.c.bf16 %v253_v62, %v252_v61  ;;  %v254_v1 = vld [vmem:[%s2505_s24 + $0x50] sm:$0xff]  ;;  %v256_v4 = vld [vmem:[%s2505_s24 + $0x60] sm:$0xff] }
  0x41   : > { %v2148_v56 = vld [vmem:[#allocation2 + $0x98] sm:$0xff]   ;;  %v257_v5 = vld [vmem:[%s2505_s24 + $0x68] sm:$0xff]  ;;  %v258_v7 = vld [vmem:[%s2505_s24 + $0x70] sm:$0xff] }
  0x42   : > { %v251_v59 = vld [vmem:[%s2505_s24 + $0x38] sm:$0xff]  ;;  %v266_v6 = vpack.c.bf16 %v257_v5, %v256_v4  ;;  %v2149_v10 = vld [vmem:[#allocation2 + $0x60] sm:$0xff]   ;;  %v2153_v14 = vld [vmem:[#allocation2 + $0x68] sm:$0xff]  }
  0x43   : > { %493 = vmatpush1.bf16.msra.mxu0 %v2119_v23  ;;  %606 = vmatpush1.bf16.msra.mxu1 %v2120_v24  ;;  %v263_v60 = vpack.c.bf16 %v251_v59, %v250_v58  ;;  %v255_v2 = vld [vmem:[%s2505_s24 + $0x58] sm:$0xff]  ;;  %v2151_v11 = vld [vmem:[#allocation2 + $0xe0] sm:$0xff]   ;;  %v2155_v15 = vld [vmem:[#allocation2 + $0xe8] sm:$0xff]  }
  0x44   : > { %494 = vmatprep.subr.bf16.mxu0 %v2121_v25  ;;  %607 = vmatprep.subr.bf16.mxu1 %v2123_v26  ;;  %v265_v3 = vpack.c.bf16 %v255_v2, %v254_v1  ;;  %v259_v8 = vld [vmem:[%s2505_s24 + $0x78] sm:$0xff]  ;;  %v2150_v12 = vld [vmem:[#allocation2 + $0x20] sm:$0xff]   ;;  %v2154_v16 = vld [vmem:[#allocation2 + $0x28] sm:$0xff]   ;;  %v302_v25 = vlaneseq }
  0x45   : > { %v267_v9 = vpack.c.bf16 %v259_v8, %v258_v7  ;;  %v2152_v13 = vld [vmem:[#allocation2 + $0xa0] sm:$0xff]   ;;  %v2156_v17 = vld [vmem:[#allocation2 + $0xa8] sm:$0xff]   ;;  %v2159_v18 = vld [vmem:[#allocation2 + $0xf0] sm:$0xff]  }
  0x46   : > { %v2158_v19 = vld [vmem:[#allocation2 + $0x30] sm:$0xff]   ;;  %v2161_v21 = vld [vmem:[#allocation2 + $0x78] sm:$0xff]   ;;  %v303_v26 = vshrl.u32 %v302_v25, 7 }
  0x47   : > { %495 = vmatpush1.bf16.msra.mxu0 %v2125_v27  ;;  %608 = vmatpush1.bf16.msra.mxu1 %v2126_v28  ;;  %v2160_v20 = vld [vmem:[#allocation2 + $0xb0] sm:$0xff]   ;;  %v2163_v22 = vld [vmem:[#allocation2 + $0xf8] sm:$0xff]  }
  0x48   : > { %496 = vmatprep.subr.bf16.mxu0 %v2127_v29  ;;  %609 = vmatprep.subr.bf16.mxu1 %v2129_v30  ;;  %v2162_v23 = vld [vmem:[#allocation2 + $0x38] sm:$0xff]   ;;  %v304_v27 = vsub.s32 0, %v303_v26  ;;  %v312_v28 = vsub.s32 2, %v303_v26  ;;  %v300_v29 = vld [vmem:[%s3469_s2] sm:$0xf]  ;;  %v308_v30 = vsub.s32 1, %v303_v26 }
  0x49   : > { %v2164_v24 = vld [vmem:[#allocation2 + $0xb8] sm:$0xff]  }
  0x4a   : > { %v2560_v33 = vrot.slane %v300_v29, %v312_v28  ;;  %v2562_v34 = vrot.slane %v300_v29, %v308_v30 }
  0x4b   : > { %497 = vmatpush1.bf16.msra.mxu0 %v2131_v31  ;;  %610 = vmatpush1.bf16.msra.mxu1 %v2132_v32  ;;  %v316_v31 = vsub.s32 3, %v303_v26  ;;  %v2558_v32 = vrot.slane %v300_v29, %v304_v27 }
  0x4c   : > { %1935 = vmatprep.subr.bf16.mxu0 %v2133_v35  ;;  %1999 = vmatprep.subr.bf16.mxu1 %v2135_v36 }
  0x4d   : > { %v2564_v35 = vrot.slane %v300_v29, %v316_v31 }
  0x4e   : > { %515 = vmatmul.mubr.bf16.vlgmr.msra.gmra.mrb[0].mxu0 %v260_v37  ;;  %628 = vmatmul.mubr.bf16.vlgmr.msra.gmra.mrb[0].mxu1 %v260_v37 }
  0x4f   : > { %524 = vmatprep.mubr.bf16.mxu0 %v2336_v0  ;;  %637 = vmatprep.mubr.bf16.mxu1 %v2336_v0 }
  0x50   : > { %1936 = vmatpush3.bf16.msra.mxu0 %v2134_v38  ;;  %2000 = vmatpush3.bf16.msra.mxu1 %v2136_v39 }
  0x51   : > { %1937 = vmatprep.subr.bf16.mxu0 %v2137_v40  ;;  %2001 = vmatprep.subr.bf16.mxu1 %v2139_v43 }
  0x54   : > { %1938 = vmatpush3.bf16.msra.mxu0 %v2138_v44  ;;  %2002 = vmatpush3.bf16.msra.mxu1 %v2140_v45 }
  0x55   : > { %1939 = vmatprep.subr.bf16.mxu0 %v2141_v46  ;;  %2003 = vmatprep.subr.bf16.mxu1 %v2143_v47 }
  0x56   : > { %525 = vmatmul.mubr.bf16.gmra.mrb[4].mxu0 %v261_v48  ;;  %638 = vmatmul.mubr.bf16.gmra.mrb[4].mxu1 %v261_v48 }
  0x57   : > { %534 = vmatprep.mubr.bf16.mxu0 %v2336_v0  ;;  %647 = vmatprep.mubr.bf16.mxu1 %v2336_v0 }
  0x58   : > { %1940 = vmatpush3.bf16.msra.mxu0 %v2142_v49  ;;  %2004 = vmatpush3.bf16.msra.mxu1 %v2144_v50 }
  0x59   : > { %1941 = vmatprep.subr.bf16.mxu0 %v2145_v53  ;;  %2005 = vmatprep.subr.bf16.mxu1 %v2147_v54 }
  0x5c   : > { %1942 = vmatpush3.bf16.msra.mxu0 %v2146_v55  ;;  %2006 = vmatpush3.bf16.msra.mxu1 %v2148_v56 }
  0x5d   : > { %1943 = vmatprep.subr.bf16.mxu0 %v2149_v10  ;;  %2007 = vmatprep.subr.bf16.mxu1 %v2151_v11 }
  0x5e   : > { %535 = vmatmul.mubr.bf16.gmra.mrb[8].mxu0 %v262_v57  ;;  %648 = vmatmul.mubr.bf16.gmra.mrb[8].mxu1 %v262_v57 }
  0x5f   : > { %544 = vmatprep.mubr.bf16.mxu0 %v2336_v0  ;;  %657 = vmatprep.mubr.bf16.mxu1 %v2336_v0 }
  0x60   : > { %1944 = vmatpush3.bf16.msra.mxu0 %v2150_v12  ;;  %2008 = vmatpush3.bf16.msra.mxu1 %v2152_v13 }
  0x61   : > { %1945 = vmatprep.subr.bf16.mxu0 %v2153_v14  ;;  %2009 = vmatprep.subr.bf16.mxu1 %v2155_v15 }
  0x64   : > { %1946 = vmatpush3.bf16.msra.mxu0 %v2154_v16  ;;  %2010 = vmatpush3.bf16.msra.mxu1 %v2156_v17 }
  0x65   : > { %2011 = vmatprep.subr.bf16.mxu1 %v2159_v18 }
  0x66   : > { %545 = vmatmul.mubr.bf16.gmra.mrb[12].mxu0 %v263_v60  ;;  %658 = vmatmul.mubr.bf16.gmra.mrb[12].mxu1 %v263_v60 }
  0x67   : > { %554 = vmatprep.mubr.bf16.mxu0 %v2336_v0  ;;  %667 = vmatprep.mubr.bf16.mxu1 %v2336_v0 }
  0x68   : > { %2012 = vmatpush3.bf16.msra.mxu1 %v2160_v20 }
  0x69   : > { %2013 = vmatprep.subr.bf16.mxu1 %v2163_v22 }
  0x6c   : > { %2014 = vmatpush3.bf16.msra.mxu1 %v2164_v24 }
  0x6e   : > { %555 = vmatmul.mubr.bf16.gmra.mrb[16].mxu0 %v264_v63  ;;  %668 = vmatmul.mubr.bf16.gmra.mrb[16].mxu1 %v264_v63 }
  0x6f   : > { %564 = vmatprep.mubr.bf16.mxu0 %v2336_v0  ;;  %677 = vmatprep.mubr.bf16.mxu1 %v2336_v0 }
  0x76   : > { %565 = vmatmul.mubr.bf16.gmra.mrb[20].mxu0 %v265_v3  ;;  %678 = vmatmul.mubr.bf16.gmra.mrb[20].mxu1 %v265_v3 }
  0x77   : > { %574 = vmatprep.mubr.bf16.mxu0 %v2336_v0  ;;  %687 = vmatprep.mubr.bf16.mxu1 %v2336_v0 }
  0x7e   : > { %575 = vmatmul.mubr.bf16.gmra.mrb[24].mxu0 %v266_v6  ;;  %688 = vmatmul.mubr.bf16.gmra.mrb[24].mxu1 %v266_v6 }
  0x7f   : > { %584 = vmatprep.mubr.bf16.mxu0 %v2336_v0  ;;  %697 = vmatprep.mubr.bf16.mxu1 %v2336_v0  ;;  %v2157_v0 = vld [vmem:[#allocation2 + $0x70] sm:$0xff]  }
  0x80   : > { %1947 = vmatprep.subr.bf16.mxu0 %v2157_v0 }
  0x81   : > { %1948 = vmatpush3.bf16.msra.mxu0 %v2158_v19 }
  0x82   : > { %1949 = vmatprep.subr.bf16.mxu0 %v2161_v21 }
  0x85   : > { %1950 = vmatpush3.bf16.msra.mxu0 %v2162_v23 }
  0x86   : > { %585 = vmatmul.mubr.bf16.gmra.mrb[28].mxu0 %v267_v9  ;;  %698 = vmatmul.mubr.bf16.gmra.mrb[28].mxu1 %v267_v9 }
 0x121   : > { %v516_v36 = vpop.f32.mrb[0].mxu0  ;;  %v629_v37 = vpop.f32.mrb[0].mxu1 }
 0x122   : > { %v2567_v38 = vadd.f32 %v516_v36, %v2558_v32  ;;  %v2570_v39 = vadd.f32 %v629_v37, %v2560_v33  ;;  %v518_v40 = vpop.f32.mrb[1].mxu0  ;;  %v631_v41 = vpop.f32.mrb[1].mxu1 }
 0x123   : > { %v2573_v42 = vadd.f32 %v518_v40, %v2562_v34  ;;  %v2576_v43 = vadd.f32 %v631_v41, %v2564_v35  ;;  %v520_v44 = vpop.f32.mrb[2].mxu0  ;;  %v633_v45 = vpop.f32.mrb[2].mxu1 }
 0x124   : > { %v708_v46 = vmul.f32 %v2567_v38, %v2567_v38  ;;  %v710_v47 = vmul.f32 %v2570_v39, %v2570_v39  ;;  %v2583_v48 = vadd.f32 %v520_v44, %v2558_v32  ;;  %v2586_v49 = vadd.f32 %v633_v45, %v2560_v33  ;;  %v522_v50 = vpop.f32.mrb[3].mxu0  ;;  %v635_v51 = vpop.f32.mrb[3].mxu1 }
 0x125   : > { %v709_v52 = vmul.f32 %v2573_v42, %v2573_v42  ;;  %v711_v53 = vmul.f32 %v2576_v43, %v2576_v43  ;;  %v2593_v54 = vadd.f32 %v522_v50, %v2562_v34  ;;  %v2596_v55 = vadd.f32 %v635_v51, %v2564_v35 }
 0x126   : > { %v772_v56 = vmul.f32 %v708_v46, %v2567_v38  ;;  %v774_v57 = vmul.f32 %v710_v47, %v2570_v39  ;;  %v712_v58 = vmul.f32 %v2583_v48, %v2583_v48  ;;  %v714_v59 = vmul.f32 %v2586_v49, %v2586_v49 }
 0x127   : > { %v773_v60 = vmul.f32 %v709_v52, %v2573_v42  ;;  %v775_v61 = vmul.f32 %v711_v53, %v2576_v43  ;;  %v713_v62 = vmul.f32 %v2593_v54, %v2593_v54  ;;  %v715_v63 = vmul.f32 %v2596_v55, %v2596_v55 }
 0x128   : > { %v836_v1 = vmul.f32 0.044715, %v772_v56  ;;  %v838_v2 = vmul.f32 0.044715, %v774_v57  ;;  %v776_v3 = vmul.f32 %v712_v58, %v2583_v48  ;;  %v778_v4 = vmul.f32 %v714_v59, %v2586_v49 }
 0x129   : > { %v837_v5 = vmul.f32 0.044715, %v773_v60  ;;  %v839_v6 = vmul.f32 0.044715, %v775_v61  ;;  %v777_v7 = vmul.f32 %v713_v62, %v2593_v54  ;;  %v779_v8 = vmul.f32 %v715_v63, %v2596_v55  ;;  %v526_v9 = vpop.f32.mrb[4].mxu0  ;;  %v639_v10 = vpop.f32.mrb[4].mxu1 }
 0x12a   : > { %v900_v11 = vadd.f32 %v836_v1, %v2567_v38  ;;  %v902_v12 = vadd.f32 %v838_v2, %v2570_v39  ;;  %v840_v13 = vmul.f32 0.044715, %v776_v3  ;;  %v842_v14 = vmul.f32 0.044715, %v778_v4  ;;  %v528_v15 = vpop.f32.mrb[5].mxu0  ;;  %v641_v16 = vpop.f32.mrb[5].mxu1 }
 0x12b   : > { %v901_v17 = vadd.f32 %v837_v5, %v2573_v42  ;;  %v903_v0 = vadd.f32 %v839_v6, %v2576_v43  ;;  %v841_v18 = vmul.f32 0.044715, %v777_v7  ;;  %v843_v19 = vmul.f32 0.044715, %v779_v8  ;;  %v530_v20 = vpop.f32.mrb[6].mxu0  ;;  %v643_v21 = vpop.f32.mrb[6].mxu1 }
 0x12c   : > { %v964_v22 = vmul.f32 0.7978846, %v900_v11  ;;  %v966_v23 = vmul.f32 0.7978846, %v902_v12  ;;  %v904_v24 = vadd.f32 %v840_v13, %v2583_v48  ;;  %v906_v25 = vadd.f32 %v842_v14, %v2586_v49  ;;  %v532_v26 = vpop.f32.mrb[7].mxu0  ;;  %v645_v27 = vpop.f32.mrb[7].mxu1 }
 0x12d   : > { %v965_v28 = vmul.f32 0.7978846, %v901_v17  ;;  %v967_v29 = vmul.f32 0.7978846, %v903_v0  ;;  %v905_v30 = vadd.f32 %v841_v18, %v2593_v54  ;;  %v907_v31 = vadd.f32 %v843_v19, %v2596_v55 }
 0x12e   : > { %2165 = vtanh.f32 %v964_v22  ;;  %v968_v36 = vmul.f32 0.7978846, %v904_v24  ;;  %v970_v37 = vmul.f32 0.7978846, %v906_v25  ;;  %v2623_v40 = vadd.f32 %v526_v9, %v2558_v32 }
 0x12f   : > { %2167 = vtanh.f32 %v966_v23  ;;  %v969_v41 = vmul.f32 0.7978846, %v905_v30  ;;  %v971_v44 = vmul.f32 0.7978846, %v907_v31  ;;  %v2626_v45 = vadd.f32 %v639_v10, %v2560_v33 }
 0x130   : > { %3520 = vst [vmem:[#allocation5_spill] sm:$0xff] %v2623_v40  ;;  %2169 = vtanh.f32 %v965_v28  ;;  %v716_v46 = vmul.f32 %v2623_v40, %v2623_v40  ;;  %v2631_v47 = vadd.f32 %v528_v15, %v2562_v34  ;;  %v2634_v50 = vadd.f32 %v641_v16, %v2564_v35 }
 0x131   : > { %3521 = vst [vmem:[#allocation6_spill] sm:$0xff] %v2626_v45  ;;  %2171 = vtanh.f32 %v967_v29  ;;  %v718_v51 = vmul.f32 %v2626_v45, %v2626_v45  ;;  %v2639_v52 = vadd.f32 %v530_v20, %v2558_v32  ;;  %v2642_v53 = vadd.f32 %v643_v21, %v2560_v33  ;;  %v2644_v56 = vpop.f32.mrb[8].mxu0  ;;  %v2646_v57 = vpop.f32.mrb[8].mxu1 }
 0x132   : > { %3522 = vst [vmem:[#allocation7_spill] sm:$0xff] %v2634_v50  ;;  %2173 = vtanh.f32 %v968_v36  ;;  %v780_v58 = vmul.f32 %v716_v46, %v2623_v40  ;;  %v717_v59 = vmul.f32 %v2631_v47, %v2631_v47  ;;  %v719_v60 = vmul.f32 %v2634_v50, %v2634_v50  ;;  %v2653_v61 = vpop.f32.mrb[9].mxu0  ;;  %v2655_v62 = vpop.f32.mrb[9].mxu1 }
 0x133   : > { %3523 = vst [vmem:[#allocation8_spill] sm:$0xff] %v2639_v52  ;;  %3524 = vst [vmem:[#allocation9_spill] sm:$0xff] %v2642_v53  ;;  %2175 = vtanh.f32 %v970_v37  ;;  %v782_v63 = vmul.f32 %v718_v51, %v2626_v45  ;;  %v720_v1 = vmul.f32 %v2639_v52, %v2639_v52  ;;  %v722_v2 = vmul.f32 %v2642_v53, %v2642_v53  ;;  %v2662_v3 = vpop.f32.mrb[10].mxu0  ;;  %v2664_v4 = vpop.f32.mrb[10].mxu1 }
 0x134   : > { %2177 = vtanh.f32 %v969_v41  ;;  %v844_v5 = vmul.f32 0.044715, %v780_v58  ;;  %v781_v6 = vmul.f32 %v717_v59, %v2631_v47  ;;  %v783_v7 = vmul.f32 %v719_v60, %v2634_v50  ;;  %v2668_v8 = vpop.f32.mrb[11].mxu0  ;;  %v2670_v9 = vpop.f32.mrb[11].mxu1 }
 0x135   : > { %2179 = vtanh.f32 %v971_v44  ;;  %v846_v10 = vmul.f32 0.044715, %v782_v63  ;;  %v784_v11 = vmul.f32 %v720_v1, %v2639_v52  ;;  %v786_v12 = vmul.f32 %v722_v2, %v2642_v53 }
 0x136   : > { %v908_v13 = vadd.f32 %v844_v5, %v2623_v40  ;;  %v845_v14 = vmul.f32 0.044715, %v781_v6  ;;  %v847_v15 = vmul.f32 0.044715, %v783_v7  ;;  %v2676_v16 = vadd.f32 %v532_v26, %v2562_v34 }
 0x137   : > { %v910_v17 = vadd.f32 %v846_v10, %v2626_v45  ;;  %v848_v0 = vmul.f32 0.044715, %v784_v11  ;;  %v850_v18 = vmul.f32 0.044715, %v786_v12  ;;  %v2680_v19 = vadd.f32 %v645_v27, %v2564_v35 }
 0x138   : > { %3525 = vst [vmem:[#allocation10_spill] sm:$0xff] %v2676_v16  ;;  %v2166_v20 = vpop.eup %2165  ;;  %v972_v21 = vmul.f32 0.7978846, %v908_v13  ;;  %v909_v22 = vadd.f32 %v845_v14, %v2631_v47  ;;  %v911_v23 = vadd.f32 %v847_v15, %v2634_v50  ;;  %v721_v24 = vmul.f32 %v2676_v16, %v2676_v16 }
 0x139   : > { %3526 = vst [vmem:[#allocation11_spill] sm:$0xff] %v2680_v19  ;;  %v2168_v25 = vpop.eup %2167  ;;  %v1092_v28 = vadd.f32 1.0, %v2166_v20  ;;  %v974_v26 = vmul.f32 0.7978846, %v910_v17  ;;  %v912_v29 = vadd.f32 %v848_v0, %v2639_v52  ;;  %v914_v30 = vadd.f32 %v850_v18, %v2642_v53  ;;  %v2688_v31 = vpop.f32.mrb[12].mxu0 }
 0x13a   : > { %v2690_v27 = vpop.f32.mrb[12].mxu1  ;;  %v2692_v36 = vpop.eup %2169  ;;  %v1094_v37 = vadd.f32 1.0, %v2168_v25  ;;  %2181 = vtanh.f32 %v972_v21  ;;  %v973_v41 = vmul.f32 0.7978846, %v909_v22  ;;  %v975_v44 = vmul.f32 0.7978846, %v911_v23 }
 0x13b   : > { %v2694_v46 = vpop.f32.mrb[13].mxu0  ;;  %v2696_v51 = vpop.eup %2171  ;;  %v1156_v58 = vmul.f32 0.5, %v1092_v28  ;;  %2183 = vtanh.f32 %v974_v26  ;;  %v976_v59 = vmul.f32 0.7978846, %v912_v29  ;;  %v978_v60 = vmul.f32 0.7978846, %v914_v30 }
 0x13c   : > { %v2698_v63 = vpop.f32.mrb[13].mxu1  ;;  %v2174_v1 = vpop.eup %2173  ;;  %v1158_v2 = vmul.f32 0.5, %v1094_v37  ;;  %2185 = vtanh.f32 %v973_v41  ;;  %v785_v5 = vmul.f32 %v721_v24, %v2676_v16  ;;  %v723_v6 = vmul.f32 %v2680_v19, %v2680_v19 }
 0x13d   : > { %v2703_v7 = vpop.f32.mrb[14].mxu0  ;;  %v2705_v10 = vpop.f32.mrb[14].mxu1  ;;  %v2708_v12 = vmul.f32 %v1156_v58, %v2567_v38  ;;  %v1096_v13 = vadd.f32 1.0, %v2174_v1  ;;  %2187 = vtanh.f32 %v975_v44  ;;  %v2712_v14 = vadd.f32 %v2644_v56, %v2558_v32 }
 0x13e   : > { %v2176_v11 = vpop.eup %2175  ;;  %v2714_v15 = vpop.f32.mrb[15].mxu0  ;;  %v2721_v18 = vmul.f32 %v1158_v2, %v2570_v39  ;;  %2189 = vtanh.f32 %v976_v59  ;;  %v849_v21 = vmul.f32 0.044715, %v785_v5  ;;  %v787_v23 = vmul.f32 %v723_v6, %v2680_v19 }
 0x13f   : > { %3527 = vst [vmem:[#allocation12_spill] sm:$0xff] %v2712_v14  ;;  %v2716_v17 = vpop.f32.mrb[15].mxu1  ;;  %v2718_v0 = vpop.eup %2177  ;;  %v1098_v20 = vadd.f32 1.0, %v2176_v11  ;;  %v1160_v22 = vmul.f32 0.5, %v1096_v13  ;;  %2191 = vtanh.f32 %v978_v60  ;;  %v724_v56 = vmul.f32 %v2712_v14, %v2712_v14 }
 0x140   : > { %v2723_v38 = vpop.eup %2179  ;;  %v913_v25 = vadd.f32 %v849_v21, %v2676_v16  ;;  %v2731_v28 = vadd.f32 %v2646_v57, %v2560_v33  ;;  %v2735_v39 = vadd.f32 %v2653_v61, %v2562_v34  ;;  %v851_v29 = vmul.f32 0.044715, %v787_v23 }
 0x141   : > { %v1162_v24 = vmul.f32 0.5, %v1098_v20  ;;  %v2738_v26 = vmul.f32 %v1160_v22, %v2583_v48  ;;  %v788_v30 = vmul.f32 %v724_v56, %v2712_v14  ;;  %v2743_v37 = vadd.f32 %v2655_v62, %v2564_v35  ;;  %v2745_v41 = vpop.f32.mrb[16].mxu0  ;;  %v2747_v44 = vpop.f32.mrb[16].mxu1 }
 0x142   : > { %3528 = vst [vmem:[#allocation13_spill] sm:$0xff] %v2731_v28  ;;  %3529 = vst [vmem:[#allocation14_spill] sm:$0xff] %v2735_v39  ;;  %v977_v58 = vmul.f32 0.7978846, %v913_v25  ;;  %v726_v61 = vmul.f32 %v2731_v28, %v2731_v28  ;;  %v725_v48 = vmul.f32 %v2735_v39, %v2735_v39  ;;  %v2756_v59 = vpop.f32.mrb[17].mxu0  ;;  %v2758_v60 = vpop.f32.mrb[17].mxu1  ;;  %v915_v1 = vadd.f32 %v851_v29, %v2680_v19 }
 0x143   : > { %3530 = vst [vmem:[#allocation15_spill] sm:$0xff] %v2743_v37  ;;  %v2750_v57 = vmul.f32 %v1162_v24, %v2586_v49  ;;  %v852_v2 = vmul.f32 0.044715, %v788_v30  ;;  %v727_v49 = vmul.f32 %v2743_v37, %v2743_v37  ;;  %v2765_v5 = vpop.f32.mrb[18].mxu0  ;;  %v2767_v6 = vpop.f32.mrb[18].mxu1  ;;  %v2785_v30 = vadd.f32 %v2662_v3, %v2558_v32 }
 0x144   : > { %v2769_v11 = vpop.eup %2181  ;;  %2193 = vtanh.f32 %v977_v58  ;;  %v790_v20 = vmul.f32 %v726_v61, %v2731_v28  ;;  %v789_v21 = vmul.f32 %v725_v48, %v2735_v39  ;;  %v2775_v22 = vpop.f32.mrb[19].mxu0  ;;  %v979_v24 = vmul.f32 0.7978846, %v915_v1 }
 0x145   : > { %v2777_v23 = vpop.f32.mrb[19].mxu1  ;;  %v2779_v56 = vpop.eup %2183  ;;  %v916_v25 = vadd.f32 %v852_v2, %v2712_v14  ;;  %v791_v29 = vmul.f32 %v727_v49, %v2743_v37  ;;  %3532 = vst [vmem:[#allocation17_spill] sm:$0xff] %v2785_v30  ;;  %v2791_v48 = vadd.f32 %v2664_v4, %v2560_v33  ;;  %v2795_v62 = vadd.f32 %v2668_v8, %v2562_v34 }
 0x146   : > { %3531 = vst [vmem:[#allocation16_spill] sm:$0xff] %v2779_v56  ;;  %v2787_v58 = vpop.eup %2185  ;;  %v854_v61 = vmul.f32 0.044715, %v790_v20  ;;  %v853_v13 = vmul.f32 0.044715, %v789_v21  ;;  %2195 = vtanh.f32 %v979_v24  ;;  %v728_v3 = vmul.f32 %v2785_v30, %v2785_v30 }
 0x147   : > { %3533 = vst [vmem:[#allocation18_spill] sm:$0xff] %v2791_v48  ;;  %3534 = vst [vmem:[#allocation19_spill] sm:$0xff] %v2795_v62  ;;  %v2797_v1 = vpop.eup %2187  ;;  %v980_v2 = vmul.f32 0.7978846, %v916_v25  ;;  %v855_v49 = vmul.f32 0.044715, %v791_v29  ;;  %v730_v4 = vmul.f32 %v2791_v48, %v2791_v48  ;;  %v729_v8 = vmul.f32 %v2795_v62, %v2795_v62 }
 0x148   : > { %v2801_v14 = vpop.eup %2189  ;;  %v918_v20 = vadd.f32 %v854_v61, %v2731_v28  ;;  %v917_v21 = vadd.f32 %v853_v13, %v2735_v39  ;;  %v792_v25 = vmul.f32 %v728_v3, %v2785_v30  ;;  %v2815_v29 = vadd.f32 %v2670_v9, %v2564_v35 }
 0x149   : > { %3535 = vst [vmem:[#allocation20_spill] sm:$0xff] %v2801_v14  ;;  %v2809_v53 = vpop.eup %2191  ;;  %2197 = vtanh.f32 %v980_v2  ;;  %v919_v24 = vadd.f32 %v855_v49, %v2743_v37  ;;  %v2817_v61 = vpop.f32.mrb[20].mxu0  ;;  %v794_v45 = vmul.f32 %v730_v4, %v2791_v48  ;;  %v793_v52 = vmul.f32 %v729_v8, %v2795_v62 }
 0x14a   : > { %3536 = vst [vmem:[#allocation21_spill] sm:$0xff] %v2809_v53  ;;  %3537 = vst [vmem:[#allocation22_spill] sm:$0xff] %v2815_v29  ;;  %v2819_v13 = vpop.f32.mrb[20].mxu1  ;;  %v982_v28 = vmul.f32 0.7978846, %v918_v20  ;;  %v2823_v40 = vpop.f32.mrb[21].mxu0  ;;  %v731_v9 = vmul.f32 %v2815_v29, %v2815_v29  ;;  %v2831_v37 = vadd.f32 %v2688_v31, %v2558_v32  ;;  %v2839_v8 = vadd.f32 %v2690_v27, %v2560_v33 }
 0x14b   : > { %v981_v39 = vmul.f32 0.7978846, %v917_v21  ;;  %v2825_v2 = vpop.f32.mrb[21].mxu1  ;;  %v983_v49 = vmul.f32 0.7978846, %v919_v24  ;;  %v2833_v53 = vpop.f32.mrb[22].mxu0 }
 0x14c   : > { %v856_v3 = vmul.f32 0.044715, %v792_v25  ;;  %3538 = vst [vmem:[#allocation23_spill] sm:$0xff] %v2831_v37  ;;  %v2835_v20 = vpop.f32.mrb[22].mxu1  ;;  %2199 = vtanh.f32 %v982_v28  ;;  %v858_v21 = vmul.f32 0.044715, %v794_v45  ;;  %v795_v31 = vmul.f32 %v731_v9, %v2815_v29 }
 0x14d   : > { %v857_v4 = vmul.f32 0.044715, %v793_v52  ;;  %3539 = vst [vmem:[#allocation24_spill] sm:$0xff] %v2839_v8  ;;  %v2841_v24 = vpop.f32.mrb[23].mxu0  ;;  %v2843_v25 = vpop.f32.mrb[23].mxu1  ;;  %2201 = vtanh.f32 %v981_v39  ;;  %v732_v19 = vmul.f32 %v2831_v37, %v2831_v37  ;;  %v734_v27 = vmul.f32 %v2839_v8, %v2839_v8 }
 0x14e   : > { %v920_v56 = vadd.f32 %v856_v3, %v2785_v30  ;;  %v2849_v14 = vpop.eup %2193  ;;  %2203 = vtanh.f32 %v983_v49  ;;  %v922_v45 = vadd.f32 %v858_v21, %v2791_v48  ;;  %v859_v50 = vmul.f32 0.044715, %v795_v31 }
 0x14f   : > { %v921_v52 = vadd.f32 %v857_v4, %v2795_v62  ;;  %v796_v39 = vmul.f32 %v732_v19, %v2831_v37  ;;  %v2858_v3 = vadd.f32 %v2694_v46, %v2562_v34  ;;  %v798_v16 = vmul.f32 %v734_v27, %v2839_v8 }
 0x150   : > { %v984_v28 = vmul.f32 0.7978846, %v920_v56  ;;  %v986_v9 = vmul.f32 0.7978846, %v922_v45  ;;  %v2863_v49 = vadd.f32 %v2698_v63, %v2564_v35  ;;  %v2865_v21 = vpop.eup %2195  ;;  %v923_v56 = vadd.f32 %v859_v50, %v2815_v29 }
 0x151   : > { %3540 = vst [vmem:[#allocation25_spill] sm:$0xff] %v2858_v3  ;;  %v985_v30 = vmul.f32 0.7978846, %v921_v52  ;;  %v860_v4 = vmul.f32 0.044715, %v796_v39  ;;  %v733_v19 = vmul.f32 %v2858_v3, %v2858_v3  ;;  %v2870_v31 = vpop.f32.mrb[24].mxu0  ;;  %v2878_v63 = vadd.f32 %v2703_v7, %v2558_v32 }
 0x152   : > { %3541 = vst [vmem:[#allocation26_spill] sm:$0xff] %v2863_v49  ;;  %2205 = vtanh.f32 %v984_v28  ;;  %v2872_v46 = vpop.f32.mrb[24].mxu1  ;;  %v862_v45 = vmul.f32 0.044715, %v798_v16  ;;  %v735_v52 = vmul.f32 %v2863_v49, %v2863_v49  ;;  %v2880_v27 = vpop.f32.mrb[25].mxu0 }
 0x153   : > { %2207 = vtanh.f32 %v986_v9  ;;  %3542 = vst [vmem:[#allocation27_spill] sm:$0xff] %v2878_v63  ;;  %3543 = vst [vmem:[#allocation28_spill] sm:$0xff] %v2880_v27  ;;  %v2882_v50 = vpop.f32.mrb[25].mxu1  ;;  %v2884_v28 = vpop.eup %2197  ;;  %v987_v39 = vmul.f32 0.7978846, %v923_v56  ;;  %v924_v48 = vadd.f32 %v860_v4, %v2831_v37  ;;  %v797_v9 = vmul.f32 %v733_v19, %v2858_v3 }
 0x154   : > { %3544 = vst [vmem:[#allocation29_spill] sm:$0xff] %v2884_v28  ;;  %2209 = vtanh.f32 %v985_v30  ;;  %v2888_v16 = vpop.f32.mrb[26].mxu0  ;;  %v2890_v29 = vpop.f32.mrb[26].mxu1  ;;  %v926_v62 = vadd.f32 %v862_v45, %v2839_v8  ;;  %v799_v7 = vmul.f32 %v735_v52, %v2863_v49  ;;  %v736_v27 = vmul.f32 %v2878_v63, %v2878_v63 }
 0x155   : > { %3545 = vst [vmem:[#allocation30_spill] sm:$0xff] %v2888_v16  ;;  %3546 = vst [vmem:[#allocation31_spill] sm:$0xff] %v2890_v29  ;;  %v2898_v28 = vadd.f32 %v2705_v10, %v2560_v33  ;;  %v2900_v30 = vpop.f32.mrb[27].mxu0  ;;  %v2902_v56 = vpop.f32.mrb[27].mxu1  ;;  %2211 = vtanh.f32 %v987_v39  ;;  %v988_v4 = vmul.f32 0.7978846, %v924_v48  ;;  %v2906_v37 = vadd.f32 %v2714_v15, %v2562_v34 }
 0x156   : > { %v861_v19 = vmul.f32 0.044715, %v797_v9  ;;  %v2908_v45 = vpop.eup %2199  ;;  %v990_v52 = vmul.f32 0.7978846, %v926_v62  ;;  %v863_v8 = vmul.f32 0.044715, %v799_v7  ;;  %v800_v29 = vmul.f32 %v736_v27, %v2878_v63 }
 0x157   : > { %3547 = vst [vmem:[#allocation32_spill] sm:$0xff] %v2898_v28  ;;  %3548 = vst [vmem:[#allocation33_spill] sm:$0xff] %v2906_v37  ;;  %v738_v10 = vmul.f32 %v2898_v28, %v2898_v28  ;;  %v2913_v16 = vpop.eup %2201  ;;  %2213 = vtanh.f32 %v988_v4  ;;  %v737_v48 = vmul.f32 %v2906_v37, %v2906_v37  ;;  %v2920_v15 = vadd.f32 %v2716_v17, %v2564_v35 }
 0x158   : > { %3549 = vst [vmem:[#allocation34_spill] sm:$0xff] %v2908_v45  ;;  %3550 = vst [vmem:[#allocation35_spill] sm:$0xff] %v2913_v16  ;;  %v925_v39 = vadd.f32 %v861_v19, %v2858_v3  ;;  %v2922_v9 = vpop.eup %2203  ;;  %2215 = vtanh.f32 %v990_v52  ;;  %v927_v62 = vadd.f32 %v863_v8, %v2863_v49  ;;  %v864_v27 = vmul.f32 0.044715, %v800_v29 }
 0x159   : > { %3551 = vst [vmem:[#allocation36_spill] sm:$0xff] %v2920_v15  ;;  %v802_v7 = vmul.f32 %v738_v10, %v2898_v28  ;;  %v801_v4 = vmul.f32 %v737_v48, %v2906_v37  ;;  %v739_v19 = vmul.f32 %v2920_v15, %v2920_v15  ;;  %v2931_v3 = vadd.f32 %v2745_v41, %v2558_v32  ;;  %v2933_v17 = vpop.f32.mrb[28].mxu0  ;;  %v2935_v16 = vpop.f32.mrb[28].mxu1 }
 0x15a   : > { %v989_v45 = vmul.f32 0.7978846, %v925_v39  ;;  %3553 = vst [vmem:[#allocation38_spill] sm:$0xff] %v2933_v17  ;;  %3554 = vst [vmem:[#allocation39_spill] sm:$0xff] %v2935_v16  ;;  %v991_v52 = vmul.f32 0.7978846, %v927_v62  ;;  %v928_v8 = vadd.f32 %v864_v27, %v2878_v63  ;;  %v2940_v10 = vadd.f32 %v2747_v44, %v2560_v33 }
 0x15b   : > { %3552 = vst [vmem:[#allocation37_spill] sm:$0xff] %v2931_v3  ;;  %v866_v29 = vmul.f32 0.044715, %v802_v7  ;;  %v2942_v39 = vpop.f32.mrb[29].mxu0  ;;  %v2944_v48 = vpop.f32.mrb[29].mxu1  ;;  %v803_v17 = vmul.f32 %v739_v19, %v2920_v15  ;;  %v740_v62 = vmul.f32 %v2931_v3, %v2931_v3 }
 0x15c   : > { %3555 = vst [vmem:[#allocation40_spill] sm:$0xff] %v2940_v10  ;;  %3556 = vst [vmem:[#allocation41_spill] sm:$0xff] %v2942_v39  ;;  %v2946_v49 = vpop.eup %2205  ;;  %2217 = vtanh.f32 %v989_v45  ;;  %v865_v41 = vmul.f32 0.044715, %v801_v4  ;;  %v2951_v16 = vpop.f32.mrb[30].mxu0 }
 0x15d   : > { %3557 = vst [vmem:[#allocation42_spill] sm:$0xff] %v2944_v48  ;;  %3558 = vst [vmem:[#allocation43_spill] sm:$0xff] %v2951_v16  ;;  %v2953_v27 = vpop.f32.mrb[30].mxu1  ;;  %v2955_v7 = vpop.eup %2207  ;;  %2219 = vtanh.f32 %v991_v52  ;;  %v992_v44 = vmul.f32 0.7978846, %v928_v8  ;;  %v930_v63 = vadd.f32 %v866_v29, %v2898_v28  ;;  %v742_v48 = vmul.f32 %v2940_v10, %v2940_v10 }
 0x15e   : > { %3559 = vst [vmem:[#allocation44_spill] sm:$0xff] %v2953_v27  ;;  %v2960_v45 = vpop.f32.mrb[31].mxu0  ;;  %v2962_v4 = vpop.f32.mrb[31].mxu1  ;;  %v929_v39 = vadd.f32 %v865_v41, %v2906_v37  ;;  %v867_v16 = vmul.f32 0.044715, %v803_v17  ;;  %v804_v27 = vmul.f32 %v740_v62, %v2931_v3  ;;  %v2970_v52 = vadd.f32 %v2756_v59, %v2562_v34 }
 0x15f   : > { %3560 = vst [vmem:[#allocation45_spill] sm:$0xff] %v2960_v45  ;;  %3561 = vst [vmem:[#allocation46_spill] sm:$0xff] %v2962_v4  ;;  %v2964_v19 = vpop.eup %2209  ;;  %2221 = vtanh.f32 %v992_v44  ;;  %v994_v8 = vmul.f32 0.7978846, %v930_v63  ;;  %v806_v29 = vmul.f32 %v742_v48, %v2940_v10  ;;  %v2975_v28 = vadd.f32 %v2758_v60, %v2564_v35 }
 0x160   : > { %3562 = vst [vmem:[#allocation47_spill] sm:$0xff] %v2970_v52  ;;  %v2977_v4 = vpop.eup %2211  ;;  %v993_v45 = vmul.f32 0.7978846, %v929_v39  ;;  %v931_v41 = vadd.f32 %v867_v16, %v2920_v15  ;;  %v868_v17 = vmul.f32 0.044715, %v804_v27  ;;  %v741_v62 = vmul.f32 %v2970_v52, %v2970_v52 }
 0x161   : > { %3563 = vst [vmem:[#allocation48_spill] sm:$0xff] %v2975_v28  ;;  %2223 = vtanh.f32 %v994_v8  ;;  %v870_v59 = vmul.f32 0.044715, %v806_v29  ;;  %v743_v63 = vmul.f32 %v2975_v28, %v2975_v28  ;;  %v2986_v48 = vadd.f32 %v2765_v5, %v2558_v32  ;;  %v2988_v60 = vpop.eup %2213 }
 0x162   : > { %3564 = vst [vmem:[#allocation49_spill] sm:$0xff] %v2988_v60  ;;  %2225 = vtanh.f32 %v993_v45  ;;  %v995_v44 = vmul.f32 0.7978846, %v931_v41  ;;  %v932_v39 = vadd.f32 %v868_v17, %v2931_v3  ;;  %v805_v16 = vmul.f32 %v741_v62, %v2970_v52  ;;  %v2992_v27 = vpop.eup %2215 }
 0x163   : > { %3565 = vst [vmem:[#allocation50_spill] sm:$0xff] %v2992_v27  ;;  %v934_v8 = vadd.f32 %v870_v59, %v2940_v10  ;;  %v807_v29 = vmul.f32 %v743_v63, %v2975_v28  ;;  %v744_v15 = vmul.f32 %v2986_v48, %v2986_v48  ;;  %v3000_v5 = vadd.f32 %v2767_v6, %v2560_v33 }
 0x164   : > { %2227 = vtanh.f32 %v995_v44  ;;  %v996_v45 = vmul.f32 0.7978846, %v932_v39  ;;  %v869_v41 = vmul.f32 0.044715, %v805_v16  ;;  %v3004_v17 = vadd.f32 %v2775_v22, %v2562_v34 }
 0x165   : > { %v998_v62 = vmul.f32 0.7978846, %v934_v8  ;;  %v871_v3 = vmul.f32 0.044715, %v807_v29  ;;  %v808_v59 = vmul.f32 %v744_v15, %v2986_v48  ;;  %v746_v63 = vmul.f32 %v3000_v5, %v3000_v5 }
 0x166   : > { %v3009_v10 = vpop.eup %2217  ;;  %2229 = vtanh.f32 %v996_v45  ;;  %v933_v6 = vadd.f32 %v869_v41, %v2970_v52  ;;  %v745_v44 = vmul.f32 %v3004_v17, %v3004_v17  ;;  %v3016_v39 = vadd.f32 %v2777_v23, %v2564_v35 }
 0x167   : > { %v3018_v22 = vpop.eup %2219  ;;  %2231 = vtanh.f32 %v998_v62  ;;  %v935_v15 = vadd.f32 %v871_v3, %v2975_v28  ;;  %v872_v16 = vmul.f32 0.044715, %v808_v59  ;;  %v810_v8 = vmul.f32 %v746_v63, %v3000_v5 }
 0x168   : > { %3566 = vst [vmem:[#allocation51_spill] sm:$0xff] %v3018_v22  ;;  %v997_v29 = vmul.f32 0.7978846, %v933_v6  ;;  %v809_v45 = vmul.f32 %v745_v44, %v3004_v17  ;;  %v747_v41 = vmul.f32 %v3016_v39, %v3016_v39  ;;  %v1093_v52 = vadd.f32 1.0, %v2692_v36 }
 0x169   : > { %v3026_v27 = vpop.eup %2221  ;;  %v999_v23 = vmul.f32 0.7978846, %v935_v15  ;;  %v936_v37 = vadd.f32 %v872_v16, %v2986_v48  ;;  %v874_v60 = vmul.f32 0.044715, %v810_v8  ;;  %v1097_v62 = vadd.f32 1.0, %v2718_v0 }
 0x16a   : > { %2233 = vtanh.f32 %v997_v29  ;;  %v873_v3 = vmul.f32 0.044715, %v809_v45  ;;  %v811_v59 = vmul.f32 %v747_v41, %v3016_v39  ;;  %v1157_v63 = vmul.f32 0.5, %v1093_v52 }
 0x16b   : > { %v3031_v6 = vpop.eup %2223  ;;  %2235 = vtanh.f32 %v999_v23  ;;  %v1000_v44 = vmul.f32 0.7978846, %v936_v37  ;;  %v938_v28 = vadd.f32 %v874_v60, %v3000_v5  ;;  %v1161_v36 = vmul.f32 0.5, %v1097_v62 }
 0x16c   : > { %v3034_v22 = vpop.eup %2225  ;;  %v937_v15 = vadd.f32 %v873_v3, %v3004_v17  ;;  %v875_v16 = vmul.f32 0.044715, %v811_v59  ;;  %v1221_v8 = vmul.f32 %v1157_v63, %v2573_v42  ;;  %v1095_v0 = vadd.f32 1.0, %v2696_v51 }
 0x16d   : > { %2237 = vtanh.f32 %v1000_v44  ;;  %v1002_v29 = vmul.f32 0.7978846, %v938_v28  ;;  %v1225_v52 = vmul.f32 %v1161_v36, %v2593_v54  ;;  %v1099_v45 = vadd.f32 1.0, %v2723_v38 }
 0x16e   : > { %v3041_v41 = vpop.eup %2227  ;;  %v1001_v37 = vmul.f32 0.7978846, %v937_v15  ;;  %v939_v60 = vadd.f32 %v875_v16, %v3016_v39  ;;  %v1159_v23 = vmul.f32 0.5, %v1095_v0  ;;  %v3046_v62 = vadd.f32 %v2817_v61, %v2558_v32 }
 0x16f   : > { %2239 = vtanh.f32 %v1002_v29  ;;  %v1285_v42 = vpack.c.bf16 %v1225_v52, %v1221_v8  ;;  %v1163_v3 = vmul.f32 0.5, %v1099_v45  ;;  %v3050_v51 = vadd.f32 %v2819_v13, %v2560_v33 }
 0x170   : > { %3567 = vst [vmem:[#allocation52_spill] sm:$0xff] %v3046_v62  ;;  %v3052_v54 = vpop.eup %2229  ;;  %2241 = vtanh.f32 %v1001_v37  ;;  %v1003_v38 = vmul.f32 0.7978846, %v939_v60  ;;  %v1223_v28 = vmul.f32 %v1159_v23, %v2576_v43  ;;  %v748_v59 = vmul.f32 %v3046_v62, %v3046_v62 }
 0x171   : > { %3568 = vst [vmem:[#allocation53_spill] sm:$0xff] %v3050_v51  ;;  %v3057_v63 = vpop.eup %2231  ;;  %1611 = vmatprep.mubr.bf16.mxu0 %v1285_v42  ;;  %v1227_v61 = vmul.f32 %v1163_v3, %v2596_v55  ;;  %v750_v44 = vmul.f32 %v3050_v51, %v3050_v51  ;;  %v3064_v13 = vadd.f32 %v2823_v40, %v2562_v34 }
 0x172   : > { %v3068_v36 = vadd.f32 %v2825_v2, %v2564_v35  ;;  %2243 = vtanh.f32 %v1003_v38  ;;  %v3569_v43 = vpack.c.bf16 %v2738_v26, %v2708_v12  ;;  %v812_v15 = vmul.f32 %v748_v59, %v3046_v62 }
 0x173   : > { %v3076_v55 = vadd.f32 %v2833_v53, %v2558_v32  ;;  %v3080_v16 = vadd.f32 %v2835_v20, %v2560_v33  ;;  %v1287_v40 = vpack.c.bf16 %v1227_v61, %v1223_v28  ;;  %v814_v8 = vmul.f32 %v750_v44, %v3050_v51 }
 0x174   : > { %1612 = vmatmul.mubr.bf16.vlgmr.msra.gmra.mrb[32].mxu0 %v3569_v43  ;;  %v749_v2 = vmul.f32 %v3064_v13, %v3064_v13  ;;  %v751_v12 = vmul.f32 %v3068_v36, %v3068_v36  ;;  %v3087_v26 = vpop.eup %2233  ;;  %v876_v0 = vmul.f32 0.044715, %v812_v15  ;;  %v3095_v20 = vadd.f32 %v2841_v24, %v2562_v34 }
 0x175   : > { %3570 = vst [vmem:[#allocation54_spill] sm:$0xff] %v3076_v55  ;;  %3571 = vst [vmem:[#allocation55_spill] sm:$0xff] %v3080_v16  ;;  %v752_v53 = vmul.f32 %v3076_v55, %v3076_v55  ;;  %v754_v29 = vmul.f32 %v3080_v16, %v3080_v16  ;;  %v3097_v52 = vpop.eup %2235  ;;  %1708 = vmatprep.mubr.bf16.mxu1 %v1287_v40  ;;  %v878_v45 = vmul.f32 0.044715, %v814_v8 }
 0x176   : > { %v813_v37 = vmul.f32 %v749_v2, %v3064_v13  ;;  %v815_v60 = vmul.f32 %v751_v12, %v3068_v36  ;;  %v3103_v23 = vadd.f32 %v2843_v25, %v2564_v35  ;;  %v3572_v42 = vpack.c.bf16 %v2750_v57, %v2721_v18 }
 0x177   : > { %v940_v3 = vadd.f32 %v876_v0, %v3046_v62  ;;  %v816_v24 = vmul.f32 %v752_v53, %v3076_v55  ;;  %v818_v38 = vmul.f32 %v754_v29, %v3080_v16  ;;  %v753_v28 = vmul.f32 %v3095_v20, %v3095_v20  ;;  %v3113_v59 = vpop.eup %2237 }
 0x178   : > { %1709 = vmatmul.mubr.bf16.vlgmr.msra.gmra.mrb[32].mxu1 %v3572_v42  ;;  %v942_v61 = vadd.f32 %v878_v45, %v3050_v51  ;;  %v877_v44 = vmul.f32 0.044715, %v813_v37  ;;  %v879_v25 = vmul.f32 0.044715, %v815_v60  ;;  %v755_v43 = vmul.f32 %v3103_v23, %v3103_v23 }
 0x179   : > { %v1004_v18 = vmul.f32 0.7978846, %v940_v3  ;;  %v880_v57 = vmul.f32 0.044715, %v816_v24  ;;  %v882_v15 = vmul.f32 0.044715, %v818_v38  ;;  %v817_v40 = vmul.f32 %v753_v28, %v3095_v20  ;;  %v3119_v8 = vpop.eup %2239 }
 0x17a   : > { %v1006_v2 = vmul.f32 0.7978846, %v942_v61  ;;  %v941_v12 = vadd.f32 %v877_v44, %v3064_v13  ;;  %v943_v0 = vadd.f32 %v879_v25, %v3068_v36  ;;  %v819_v53 = vmul.f32 %v755_v43, %v3103_v23  ;;  %v3124_v29 = vpop.eup %2241 }
 0x17b   : > { %2245 = vtanh.f32 %v1004_v18  ;;  %v944_v45 = vadd.f32 %v880_v57, %v3076_v55  ;;  %v946_v37 = vadd.f32 %v882_v15, %v3080_v16  ;;  %v881_v60 = vmul.f32 0.044715, %v817_v40 }
 0x17c   : > { %2247 = vtanh.f32 %v1006_v2  ;;  %v1005_v42 = vmul.f32 0.7978846, %v941_v12  ;;  %v1007_v3 = vmul.f32 0.7978846, %v943_v0  ;;  %v883_v24 = vmul.f32 0.044715, %v819_v53  ;;  %v3128_v38 = vpop.eup %2243 }
 0x17d   : > { %v1008_v28 = vmul.f32 0.7978846, %v944_v45  ;;  %v1010_v61 = vmul.f32 0.7978846, %v946_v37  ;;  %v945_v44 = vadd.f32 %v881_v60, %v3095_v20  ;;  %v1101_v25 = vadd.f32 1.0, %v2787_v58  ;;  %v3573_v60 = vld [vmem:[#allocation10_spill] sm:$0xff] }
 0x17e   : > { %2249 = vtanh.f32 %v1005_v42  ;;  %v947_v43 = vadd.f32 %v883_v24, %v3103_v23  ;;  %v1105_v18 = vadd.f32 1.0, %v2849_v14  ;;  %v1103_v57 = vadd.f32 1.0, %v2797_v1  ;;  %v3574_v42 = vld [vmem:[#allocation7_spill] sm:$0xff] }
 0x17f   : > { %2251 = vtanh.f32 %v1007_v3  ;;  %v1009_v15 = vmul.f32 0.7978846, %v945_v44  ;;  %v1165_v40 = vmul.f32 0.5, %v1101_v25  ;;  %v1107_v2 = vadd.f32 1.0, %v2865_v21  ;;  %v3575_v3 = vld [vmem:[#allocation20_spill] sm:$0xff]  ;;  %v3576_v44 = vld [vmem:[#allocation11_spill] sm:$0xff] }
 0x180   : > { %2253 = vtanh.f32 %v1008_v28  ;;  %v1011_v12 = vmul.f32 0.7978846, %v947_v43  ;;  %v1169_v0 = vmul.f32 0.5, %v1105_v18  ;;  %v1167_v53 = vmul.f32 0.5, %v1103_v57  ;;  %v3577_v25 = vld [vmem:[#allocation16_spill] sm:$0xff]  ;;  %v3578_v57 = vld [vmem:[#allocation21_spill] sm:$0xff] }
 0x181   : > { %2255 = vtanh.f32 %v1010_v61  ;;  %v1229_v45 = vmul.f32 %v1165_v40, %v2631_v47  ;;  %v1171_v58 = vmul.f32 0.5, %v1107_v2  ;;  %v1100_v37 = vadd.f32 1.0, %v2769_v11  ;;  %v3580_v2 = vld [vmem:[#allocation5_spill] sm:$0xff] }
 0x182   : > { %2257 = vtanh.f32 %v1009_v15  ;;  %v1233_v14 = vmul.f32 %v1169_v0, %v3573_v60  ;;  %v1231_v1 = vmul.f32 %v1167_v53, %v3574_v42  ;;  %v1104_v24 = vadd.f32 1.0, %v3575_v3 }
 0x183   : > { %2259 = vtanh.f32 %v1011_v12  ;;  %v1235_v21 = vmul.f32 %v1171_v58, %v3576_v44  ;;  %v1164_v28 = vmul.f32 0.5, %v1100_v37  ;;  %v1102_v43 = vadd.f32 1.0, %v3577_v25  ;;  %v3586_v44 = vld [vmem:[#allocation30_spill] sm:$0xff] }
 0x184   : > { %v1289_v18 = vpack.c.bf16 %v1233_v14, %v1229_v45  ;;  %v1168_v61 = vmul.f32 0.5, %v1104_v24  ;;  %v1106_v47 = vadd.f32 1.0, %v3578_v57  ;;  %v3146_v11 = vadd.f32 %v2870_v31, %v2558_v32  ;;  %v3582_v45 = vld [vmem:[#allocation8_spill] sm:$0xff] }
 0x185   : > { %v3148_v15 = vpop.eup %2245  ;;  %v1291_v40 = vpack.c.bf16 %v1235_v21, %v1231_v1  ;;  %v1228_v0 = vmul.f32 %v1164_v28, %v3580_v2  ;;  %v1166_v53 = vmul.f32 0.5, %v1102_v43  ;;  %v3153_v12 = vadd.f32 %v2872_v46, %v2560_v33  ;;  %v3583_v14 = vld [vmem:[#allocation28_spill] sm:$0xff]  ;;  %v3585_v1 = vld [vmem:[#allocation6_spill] sm:$0xff]  ;;  %v3588_v43 = vld [vmem:[#allocation9_spill] sm:$0xff] }
 0x186   : > { %3579 = vst [vmem:[#allocation10_spill] sm:$0xff] %v3146_v11  ;;  %v3155_v58 = vpop.eup %2247  ;;  %1619 = vmatprep.mubr.bf16.mxu0 %v1289_v18  ;;  %v1232_v37 = vmul.f32 %v1168_v61, %v3582_v45  ;;  %v1170_v60 = vmul.f32 0.5, %v1106_v47  ;;  %v756_v31 = vmul.f32 %v3146_v11, %v3146_v11  ;;  %v3162_v42 = vadd.f32 %v3583_v14, %v2562_v34 }
 0x187   : > { %3581 = vst [vmem:[#allocation7_spill] sm:$0xff] %v3153_v12  ;;  %1716 = vmatprep.mubr.bf16.mxu1 %v1291_v40  ;;  %v1230_v3 = vmul.f32 %v1166_v53, %v3585_v1  ;;  %v758_v46 = vmul.f32 %v3153_v12, %v3153_v12  ;;  %v3169_v24 = vadd.f32 %v2882_v50, %v2564_v35  ;;  %v3589_v53 = vld [vmem:[#allocation31_spill] sm:$0xff] }
 0x188   : > { %3584 = vst [vmem:[#allocation20_spill] sm:$0xff] %v3162_v42  ;;  %v3173_v21 = vadd.f32 %v3586_v44, %v2558_v32  ;;  %v3175_v28 = vpop.eup %2249  ;;  %v1288_v25 = vpack.c.bf16 %v1232_v37, %v1228_v0  ;;  %v1234_v18 = vmul.f32 %v1170_v60, %v3588_v43  ;;  %v820_v61 = vmul.f32 %v756_v31, %v3146_v11 }
 0x189   : > { %v757_v57 = vmul.f32 %v3162_v42, %v3162_v42  ;;  %v3181_v47 = vpop.eup %2251  ;;  %v822_v40 = vmul.f32 %v758_v46, %v3153_v12  ;;  %v759_v50 = vmul.f32 %v3169_v24, %v3169_v24  ;;  %v3190_v0 = vadd.f32 %v3589_v53, %v2560_v33 }
 0x18a   : > { %3587 = vst [vmem:[#allocation11_spill] sm:$0xff] %v3173_v21  ;;  %v760_v2 = vmul.f32 %v3173_v21, %v3173_v21  ;;  %v3192_v45 = vpop.eup %2253  ;;  %1620 = vmatmul.mubr.bf16.gmra.mrb[36].mxu0 %v1288_v25  ;;  %v1290_v37 = vpack.c.bf16 %v1234_v18, %v1230_v3  ;;  %v884_v60 = vmul.f32 0.044715, %v820_v61  ;;  %v3197_v14 = vadd.f32 %v2900_v30, %v2562_v34 }
 0x18b   : > { %3590 = vst [vmem:[#allocation16_spill] sm:$0xff] %v3190_v0  ;;  %v821_v31 = vmul.f32 %v757_v57, %v3162_v42  ;;  %v3199_v1 = vpop.eup %2255  ;;  %v886_v46 = vmul.f32 0.044715, %v822_v40  ;;  %v823_v44 = vmul.f32 %v759_v50, %v3169_v24  ;;  %v762_v53 = vmul.f32 %v3190_v0, %v3190_v0 }
 0x18c   : > { %v824_v43 = vmul.f32 %v760_v2, %v3173_v21  ;;  %v3205_v16 = vpop.eup %2257  ;;  %1717 = vmatmul.mubr.bf16.gmra.mrb[36].mxu1 %v1290_v37  ;;  %v948_v3 = vadd.f32 %v884_v60, %v3146_v11  ;;  %v761_v30 = vmul.f32 %v3197_v14, %v3197_v14  ;;  %v3212_v18 = vadd.f32 %v2902_v56, %v2564_v35 }
 0x18d   : > { %v885_v25 = vmul.f32 0.044715, %v821_v31  ;;  %v3214_v61 = vpop.eup %2259  ;;  %v950_v57 = vadd.f32 %v886_v46, %v3153_v12  ;;  %v887_v40 = vmul.f32 0.044715, %v823_v44  ;;  %v826_v2 = vmul.f32 %v762_v53, %v3190_v0 }
 0x18e   : > { %3591 = vst [vmem:[#allocation21_spill] sm:$0xff] %v3212_v18  ;;  %v888_v50 = vmul.f32 0.044715, %v824_v43  ;;  %v1012_v51 = vmul.f32 0.7978846, %v948_v3  ;;  %v825_v60 = vmul.f32 %v761_v30, %v3197_v14  ;;  %v763_v31 = vmul.f32 %v3212_v18, %v3212_v18 }
 0x18f   : > { %v949_v37 = vadd.f32 %v885_v25, %v3162_v42  ;;  %v1014_v11 = vmul.f32 0.7978846, %v950_v57  ;;  %v951_v56 = vadd.f32 %v887_v40, %v3169_v24  ;;  %v890_v62 = vmul.f32 0.044715, %v826_v2  ;;  %v3592_v57 = vld [vmem:[#allocation35_spill] sm:$0xff] }
 0x190   : > { %v952_v55 = vadd.f32 %v888_v50, %v3173_v21  ;;  %2261 = vtanh.f32 %v1012_v51  ;;  %v889_v44 = vmul.f32 0.044715, %v825_v60  ;;  %v827_v43 = vmul.f32 %v763_v31, %v3212_v18 }
 0x191   : > { %v1013_v46 = vmul.f32 0.7978846, %v949_v37  ;;  %2263 = vtanh.f32 %v1014_v11  ;;  %v1015_v53 = vmul.f32 0.7978846, %v951_v56  ;;  %v954_v25 = vadd.f32 %v890_v62, %v3190_v0  ;;  %v3593_v56 = vld [vmem:[#allocation14_spill] sm:$0xff] }
 0x192   : > { %v1016_v3 = vmul.f32 0.7978846, %v952_v55  ;;  %v953_v30 = vadd.f32 %v889_v44, %v3197_v14  ;;  %v891_v12 = vmul.f32 0.044715, %v827_v43  ;;  %v1109_v42 = vadd.f32 1.0, %v3592_v57  ;;  %v3594_v44 = vld [vmem:[#allocation29_spill] sm:$0xff] }
 0x193   : > { %2265 = vtanh.f32 %v1013_v46  ;;  %v1018_v40 = vmul.f32 0.7978846, %v954_v25  ;;  %v1113_v50 = vadd.f32 1.0, %v2964_v19  ;;  %v1111_v51 = vadd.f32 1.0, %v2922_v9  ;;  %v3596_v9 = vld [vmem:[#allocation15_spill] sm:$0xff] }
 0x194   : > { %2267 = vtanh.f32 %v1015_v53  ;;  %v1017_v2 = vmul.f32 0.7978846, %v953_v30  ;;  %v955_v11 = vadd.f32 %v891_v12, %v3212_v18  ;;  %v1173_v37 = vmul.f32 0.5, %v1109_v42  ;;  %v3595_v53 = vld [vmem:[#allocation19_spill] sm:$0xff]  ;;  %v3597_v42 = vld [vmem:[#allocation34_spill] sm:$0xff] }
 0x195   : > { %2269 = vtanh.f32 %v1016_v3  ;;  %v1177_v55 = vmul.f32 0.5, %v1113_v50  ;;  %v1115_v62 = vadd.f32 1.0, %v2977_v4  ;;  %v1175_v60 = vmul.f32 0.5, %v1111_v51  ;;  %v3598_v50 = vld [vmem:[#allocation22_spill] sm:$0xff] }
 0x196   : > { %2271 = vtanh.f32 %v1018_v40  ;;  %v1019_v31 = vmul.f32 0.7978846, %v955_v11  ;;  %v1237_v46 = vmul.f32 %v1173_v37, %v3593_v56  ;;  %v1108_v43 = vadd.f32 1.0, %v3594_v44  ;;  %v3599_v11 = vld [vmem:[#allocation38_spill] sm:$0xff] }
 0x197   : > { %2273 = vtanh.f32 %v1017_v2  ;;  %v1241_v19 = vmul.f32 %v1177_v55, %v3595_v53  ;;  %v1179_v25 = vmul.f32 0.5, %v1115_v62  ;;  %v1239_v3 = vmul.f32 %v1175_v60, %v3596_v9  ;;  %v3601_v62 = vld [vmem:[#allocation12_spill] sm:$0xff] }
 0x198   : > { %v1112_v30 = vadd.f32 1.0, %v2946_v49  ;;  %2275 = vtanh.f32 %v1019_v31  ;;  %v1172_v12 = vmul.f32 0.5, %v1108_v43  ;;  %v1110_v57 = vadd.f32 1.0, %v3597_v42  ;;  %v3602_v31 = vld [vmem:[#allocation39_spill] sm:$0xff] }
 0x199   : > { %v1114_v4 = vadd.f32 1.0, %v2955_v7  ;;  %v1293_v40 = vpack.c.bf16 %v1241_v19, %v1237_v46  ;;  %v1243_v51 = vmul.f32 %v1179_v25, %v3598_v50  ;;  %v3242_v37 = vadd.f32 %v3599_v11, %v2558_v32  ;;  %v3605_v46 = vld [vmem:[#allocation17_spill] sm:$0xff] }
 0x19a   : > { %v1176_v2 = vmul.f32 0.5, %v1112_v30  ;;  %v3244_v55 = vpop.eup %2261  ;;  %v1236_v60 = vmul.f32 %v1172_v12, %v3601_v62  ;;  %v1174_v56 = vmul.f32 0.5, %v1110_v57  ;;  %v3249_v44 = vadd.f32 %v3602_v31, %v2560_v33  ;;  %v3606_v25 = vld [vmem:[#allocation41_spill] sm:$0xff]  ;;  %v3608_v57 = vld [vmem:[#allocation18_spill] sm:$0xff] }
 0x19b   : > { %3600 = vst [vmem:[#allocation5_spill] sm:$0xff] %v3242_v37  ;;  %v1178_v49 = vmul.f32 0.5, %v1114_v4  ;;  %v3251_v43 = vpop.eup %2263  ;;  %1627 = vmatprep.mubr.bf16.mxu0 %v1293_v40  ;;  %v1295_v7 = vpack.c.bf16 %v1243_v51, %v1239_v3  ;;  %v764_v19 = vmul.f32 %v3242_v37, %v3242_v37  ;;  %v3258_v9 = vadd.f32 %v3606_v25, %v2562_v34  ;;  %v3607_v12 = vld [vmem:[#allocation13_spill] sm:$0xff]  ;;  %v3609_v3 = vld [vmem:[#allocation42_spill] sm:$0xff] }
 0x19c   : > { %3603 = vst [vmem:[#allocation8_spill] sm:$0xff] %v3249_v44  ;;  %3604 = vst [vmem:[#allocation28_spill] sm:$0xff] %v3251_v43  ;;  %v1240_v53 = vmul.f32 %v1176_v2, %v3605_v46  ;;  %v1238_v42 = vmul.f32 %v1174_v56, %v3607_v12  ;;  %v766_v50 = vmul.f32 %v3249_v44, %v3249_v44  ;;  %v3610_v56 = vld [vmem:[#allocation43_spill] sm:$0xff] }
 0x19d   : > { %v3260_v30 = vpop.eup %2265  ;;  %v1242_v4 = vmul.f32 %v1178_v49, %v3608_v57  ;;  %v3268_v40 = vadd.f32 %v3609_v3, %v2564_v35  ;;  %1724 = vmatprep.mubr.bf16.mxu1 %v1295_v7  ;;  %v828_v11 = vmul.f32 %v764_v19, %v3242_v37  ;;  %v765_v62 = vmul.f32 %v3258_v9, %v3258_v9  ;;  %v3611_v7 = vld [vmem:[#allocation44_spill] sm:$0xff] }
 0x19e   : > { %v3270_v51 = vpop.eup %2267  ;;  %v1292_v2 = vpack.c.bf16 %v1240_v53, %v1236_v60  ;;  %v3277_v31 = vadd.f32 %v3610_v56, %v2558_v32  ;;  %v830_v25 = vmul.f32 %v766_v50, %v3249_v44  ;;  %v3286_v60 = vadd.f32 %v3611_v7, %v2560_v33 }
 0x19f   : > { %v3279_v49 = vpop.eup %2269  ;;  %v1294_v46 = vpack.c.bf16 %v1242_v4, %v1238_v42  ;;  %v767_v12 = vmul.f32 %v3268_v40, %v3268_v40  ;;  %v892_v19 = vmul.f32 0.044715, %v828_v11  ;;  %v829_v57 = vmul.f32 %v765_v62, %v3258_v9  ;;  %v3613_v42 = vld [vmem:[#allocation45_spill] sm:$0xff] }
 0x1a0   : > { %v3288_v53 = vpop.eup %2271  ;;  %1628 = vmatmul.mubr.bf16.gmra.mrb[40].mxu0 %v1292_v2  ;;  %v768_v32 = vmul.f32 %v3277_v31, %v3277_v31  ;;  %v3295_v4 = vadd.f32 %v3613_v42, %v2562_v34  ;;  %v894_v3 = vmul.f32 0.044715, %v830_v25  ;;  %v770_v56 = vmul.f32 %v3286_v60, %v3286_v60  ;;  %v3614_v2 = vld [vmem:[#allocation46_spill] sm:$0xff] }
 0x1a1   : > { %3612 = vst [vmem:[#allocation6_spill] sm:$0xff] %v3288_v53  ;;  %v3297_v50 = vpop.eup %2273  ;;  %1725 = vmatmul.mubr.bf16.gmra.mrb[40].mxu1 %v1294_v46  ;;  %v831_v33 = vmul.f32 %v767_v12, %v3268_v40  ;;  %v3304_v11 = vadd.f32 %v3614_v2, %v2564_v35  ;;  %v956_v62 = vadd.f32 %v892_v19, %v3242_v37  ;;  %v893_v7 = vmul.f32 0.044715, %v829_v57 }
 0x1a2   : > { %v832_v0 = vmul.f32 %v768_v32, %v3277_v31  ;;  %v769_v34 = vmul.f32 %v3295_v4, %v3295_v4  ;;  %v3310_v42 = vpop.eup %2275  ;;  %v958_v46 = vadd.f32 %v894_v3, %v3249_v44  ;;  %v834_v12 = vmul.f32 %v770_v56, %v3286_v60 }
 0x1a3   : > { %v895_v25 = vmul.f32 0.044715, %v831_v33  ;;  %v771_v21 = vmul.f32 %v3304_v11, %v3304_v11  ;;  %v1020_v35 = vmul.f32 0.7978846, %v956_v62  ;;  %v957_v2 = vadd.f32 %v893_v7, %v3258_v9 }
 0x1a4   : > { %v896_v19 = vmul.f32 0.044715, %v832_v0  ;;  %v833_v57 = vmul.f32 %v769_v34, %v3295_v4  ;;  %v1022_v32 = vmul.f32 0.7978846, %v958_v46  ;;  %v898_v18 = vmul.f32 0.044715, %v834_v12 }
 0x1a5   : > { %v959_v37 = vadd.f32 %v895_v25, %v3268_v40  ;;  %v835_v53 = vmul.f32 %v771_v21, %v3304_v11  ;;  %2277 = vtanh.f32 %v1020_v35  ;;  %v1021_v3 = vmul.f32 0.7978846, %v957_v2  ;;  %v3615_v2 = vld [vmem:[#allocation51_spill] sm:$0xff] }
 0x1a6   : > { %v960_v33 = vadd.f32 %v896_v19, %v3277_v31  ;;  %v897_v56 = vmul.f32 0.044715, %v833_v57  ;;  %2279 = vtanh.f32 %v1022_v32  ;;  %v962_v62 = vadd.f32 %v898_v18, %v3286_v60  ;;  %v3616_v57 = vld [vmem:[#allocation25_spill] sm:$0xff] }
 0x1a7   : > { %v1023_v44 = vmul.f32 0.7978846, %v959_v37  ;;  %v899_v43 = vmul.f32 0.044715, %v835_v53  ;;  %2281 = vtanh.f32 %v1021_v3  ;;  %v1117_v34 = vadd.f32 1.0, %v3009_v10 }
 0x1a8   : > { %v1024_v0 = vmul.f32 0.7978846, %v960_v33  ;;  %v961_v7 = vadd.f32 %v897_v56, %v3295_v4  ;;  %v1026_v46 = vmul.f32 0.7978846, %v962_v62  ;;  %v1121_v25 = vadd.f32 1.0, %v3034_v22  ;;  %v3619_v62 = vld [vmem:[#allocation26_spill] sm:$0xff] }
 0x1a9   : > { %2283 = vtanh.f32 %v1023_v44  ;;  %v963_v21 = vadd.f32 %v899_v43, %v3304_v11  ;;  %v1181_v35 = vmul.f32 0.5, %v1117_v34  ;;  %v1119_v37 = vadd.f32 1.0, %v3615_v2  ;;  %v3617_v44 = vld [vmem:[#allocation49_spill] sm:$0xff]  ;;  %v3620_v34 = vld [vmem:[#allocation50_spill] sm:$0xff] }
 0x1aa   : > { %2285 = vtanh.f32 %v1024_v0  ;;  %v1025_v12 = vmul.f32 0.7978846, %v961_v7  ;;  %v1185_v53 = vmul.f32 0.5, %v1121_v25  ;;  %v1123_v19 = vadd.f32 1.0, %v3041_v41  ;;  %v3618_v43 = vld [vmem:[#allocation33_spill] sm:$0xff]  ;;  %v3621_v25 = vld [vmem:[#allocation36_spill] sm:$0xff] }
 0x1ab   : > { %2287 = vtanh.f32 %v1026_v46  ;;  %v1027_v18 = vmul.f32 0.7978846, %v963_v21  ;;  %v1245_v32 = vmul.f32 %v1181_v35, %v3616_v57  ;;  %v1183_v10 = vmul.f32 0.5, %v1119_v37 }
 0x1ac   : > { %2289 = vtanh.f32 %v1025_v12  ;;  %v1116_v3 = vadd.f32 1.0, %v3617_v44  ;;  %v1249_v33 = vmul.f32 %v1185_v53, %v3618_v43  ;;  %v1187_v22 = vmul.f32 0.5, %v1123_v19 }
 0x1ad   : > { %2291 = vtanh.f32 %v1027_v18  ;;  %v1120_v56 = vadd.f32 1.0, %v3026_v27  ;;  %v1247_v0 = vmul.f32 %v1183_v10, %v3619_v62  ;;  %v1118_v46 = vadd.f32 1.0, %v3620_v34  ;;  %v3622_v18 = vld [vmem:[#allocation23_spill] sm:$0xff] }
 0x1ae   : > { %v1180_v7 = vmul.f32 0.5, %v1116_v3  ;;  %v1122_v21 = vadd.f32 1.0, %v3031_v6  ;;  %v1297_v41 = vpack.c.bf16 %v1249_v33, %v1245_v32  ;;  %v1251_v12 = vmul.f32 %v1187_v22, %v3621_v25  ;;  %v3623_v3 = vld [vmem:[#allocation27_spill] sm:$0xff] }
 0x1af   : > { %v1184_v35 = vmul.f32 0.5, %v1120_v56  ;;  %v1125_v2 = vadd.f32 1.0, %v3087_v26  ;;  %v3337_v37 = vpop.eup %2277  ;;  %v1182_v19 = vmul.f32 0.5, %v1118_v46  ;;  %v1129_v27 = vadd.f32 1.0, %v3124_v29  ;;  %v3624_v26 = vld [vmem:[#allocation24_spill] sm:$0xff] }
 0x1b0   : > { %v1244_v53 = vmul.f32 %v1180_v7, %v3622_v18  ;;  %v1186_v57 = vmul.f32 0.5, %v1122_v21  ;;  %v3341_v10 = vpop.eup %2279  ;;  %1635 = vmatprep.mubr.bf16.mxu0 %v1297_v41  ;;  %v1299_v44 = vpack.c.bf16 %v1251_v12, %v1247_v0  ;;  %v1127_v43 = vadd.f32 1.0, %v3097_v52  ;;  %v3625_v56 = vld [vmem:[#allocation32_spill] sm:$0xff]  ;;  %v3626_v21 = vld [vmem:[#allocation47_spill] sm:$0xff] }
 0x1b1   : > { %v1248_v6 = vmul.f32 %v1184_v35, %v3623_v3  ;;  %v1189_v32 = vmul.f32 0.5, %v1125_v2  ;;  %v3345_v33 = vpop.eup %2281  ;;  %v1246_v22 = vmul.f32 %v1182_v19, %v3624_v26  ;;  %v1193_v7 = vmul.f32 0.5, %v1129_v27 }
 0x1b2   : > { %v1250_v62 = vmul.f32 %v1186_v57, %v3625_v56  ;;  %v1131_v34 = vadd.f32 1.0, %v3128_v38  ;;  %1732 = vmatprep.mubr.bf16.mxu1 %v1299_v44  ;;  %v1191_v41 = vmul.f32 0.5, %v1127_v43  ;;  %v1124_v25 = vadd.f32 1.0, %v3052_v54  ;;  %v3627_v38 = vld [vmem:[#allocation48_spill] sm:$0xff]  ;;  %v3628_v43 = vld [vmem:[#allocation37_spill] sm:$0xff] }
 0x1b3   : > { %v3350_v46 = vpop.eup %2283  ;;  %v1296_v29 = vpack.c.bf16 %v1248_v6, %v1244_v53  ;;  %v1253_v0 = vmul.f32 %v1189_v32, %v3626_v21  ;;  %v1257_v35 = vmul.f32 %v1193_v7, %v3004_v17  ;;  %v1128_v18 = vadd.f32 1.0, %v3113_v59 }
 0x1b4   : > { %v3354_v12 = vpop.eup %2285  ;;  %v1298_v52 = vpack.c.bf16 %v1250_v62, %v1246_v22  ;;  %v1195_v2 = vmul.f32 0.5, %v1131_v34  ;;  %v1255_v57 = vmul.f32 %v1191_v41, %v3627_v38  ;;  %v1188_v27 = vmul.f32 0.5, %v1124_v25 }
 0x1b5   : > { %v3358_v19 = vpop.eup %2287  ;;  %1636 = vmatmul.mubr.bf16.gmra.mrb[44].mxu0 %v1296_v29  ;;  %v1126_v53 = vadd.f32 1.0, %v3057_v63  ;;  %v1130_v44 = vadd.f32 1.0, %v3119_v8  ;;  %v1301_v54 = vpack.c.bf16 %v1257_v35, %v1253_v0  ;;  %v1192_v17 = vmul.f32 0.5, %v1128_v18  ;;  %v3629_v29 = vld [vmem:[#allocation40_spill] sm:$0xff] }
 0x1b6   : > { %v3363_v3 = vpop.eup %2289  ;;  %1733 = vmatmul.mubr.bf16.gmra.mrb[44].mxu1 %v1298_v52  ;;  %v1259_v6 = vmul.f32 %v1195_v2, %v3016_v39  ;;  %v1133_v32 = vadd.f32 1.0, %v3175_v28  ;;  %v1252_v26 = vmul.f32 %v1188_v27, %v3628_v43  ;;  %v1137_v62 = vadd.f32 1.0, %v3205_v16 }
 0x1b7   : > { %v3367_v59 = vpop.eup %2291  ;;  %v1190_v22 = vmul.f32 0.5, %v1126_v53  ;;  %v1194_v56 = vmul.f32 0.5, %v1130_v44  ;;  %1643 = vmatprep.mubr.bf16.mxu0 %v1301_v54  ;;  %v1256_v8 = vmul.f32 %v1192_v17, %v2986_v48  ;;  %v1135_v34 = vadd.f32 1.0, %v3181_v47  ;;  %v3630_v53 = vld [vmem:[#allocation52_spill] sm:$0xff] }
 0x1b8   : > { %v1303_v63 = vpack.c.bf16 %v1259_v6, %v1255_v57  ;;  %v1197_v7 = vmul.f32 0.5, %v1133_v32  ;;  %v1201_v28 = vmul.f32 0.5, %v1137_v62  ;;  %v1139_v0 = vadd.f32 1.0, %v3214_v61  ;;  %v3631_v6 = vld [vmem:[#allocation54_spill] sm:$0xff]  ;;  %v3632_v32 = vld [vmem:[#allocation53_spill] sm:$0xff]  ;;  %v3634_v62 = vld [vmem:[#allocation20_spill] sm:$0xff] }
 0x1b9   : > { %v1254_v39 = vmul.f32 %v1190_v22, %v3629_v29  ;;  %v1258_v21 = vmul.f32 %v1194_v56, %v3000_v5  ;;  %v1300_v41 = vpack.c.bf16 %v1256_v8, %v1252_v26  ;;  %v1199_v52 = vmul.f32 0.5, %v1135_v34 }
 0x1ba   : > { %1740 = vmatprep.mubr.bf16.mxu1 %v1303_v63  ;;  %v1261_v25 = vmul.f32 %v1197_v7, %v3064_v13  ;;  %v1132_v16 = vadd.f32 1.0, %v3148_v15  ;;  %v1265_v48 = vmul.f32 %v1201_v28, %v3095_v20  ;;  %v1203_v2 = vmul.f32 0.5, %v1139_v0  ;;  %v3635_v28 = vld [vmem:[#allocation28_spill] sm:$0xff] }
 0x1bb   : > { %v1302_v35 = vpack.c.bf16 %v1258_v21, %v1254_v39  ;;  %v1136_v47 = vadd.f32 1.0, %v3192_v45  ;;  %v1263_v18 = vmul.f32 %v1199_v52, %v3068_v36  ;;  %v1134_v5 = vadd.f32 1.0, %v3155_v58  ;;  %v3637_v52 = vld [vmem:[#allocation21_spill] sm:$0xff] }
 0x1bc   : > { %v1196_v38 = vmul.f32 0.5, %v1132_v16  ;;  %v1138_v61 = vadd.f32 1.0, %v3199_v1  ;;  %v1305_v57 = vpack.c.bf16 %v1265_v48, %v1261_v25  ;;  %v1267_v13 = vmul.f32 %v1203_v2, %v3103_v23  ;;  %v3633_v23 = vld [vmem:[#allocation55_spill] sm:$0xff] }
 0x1bd   : > { %1644 = vmatmul.mubr.bf16.gmra.mrb[48].mxu0 %v1300_v41  ;;  %v1200_v27 = vmul.f32 0.5, %v1136_v47  ;;  %v1141_v15 = vadd.f32 1.0, %v3260_v30  ;;  %v1198_v44 = vmul.f32 0.5, %v1134_v5  ;;  %v1145_v45 = vadd.f32 1.0, %v3297_v50  ;;  %v3636_v41 = vld [vmem:[#allocation6_spill] sm:$0xff] }
 0x1be   : > { %1741 = vmatmul.mubr.bf16.gmra.mrb[48].mxu1 %v1302_v35  ;;  %v1260_v20 = vmul.f32 %v1196_v38, %v3630_v53  ;;  %v1202_v54 = vmul.f32 0.5, %v1138_v61  ;;  %1651 = vmatprep.mubr.bf16.mxu0 %v1305_v57  ;;  %v1307_v36 = vpack.c.bf16 %v1267_v13, %v1263_v18  ;;  %v1143_v1 = vadd.f32 1.0, %v3270_v51  ;;  %v3639_v18 = vld [vmem:[#allocation11_spill] sm:$0xff] }
 0x1bf   : > { %v1264_v58 = vmul.f32 %v1200_v27, %v3631_v6  ;;  %v1205_v17 = vmul.f32 0.5, %v1141_v15  ;;  %v1262_v43 = vmul.f32 %v1198_v44, %v3632_v32  ;;  %v1209_v22 = vmul.f32 0.5, %v1145_v45  ;;  %v3640_v57 = vld [vmem:[#allocation7_spill] sm:$0xff]  ;;  %v3641_v27 = vld [vmem:[#allocation16_spill] sm:$0xff] }
 0x1c0   : > { %v1266_v26 = vmul.f32 %v1202_v54, %v3633_v23  ;;  %v1147_v30 = vadd.f32 1.0, %v3310_v42  ;;  %1748 = vmatprep.mubr.bf16.mxu1 %v1307_v36  ;;  %v1207_v8 = vmul.f32 0.5, %v1143_v1  ;;  %v1140_v50 = vadd.f32 1.0, %v3244_v55  ;;  %v3638_v55 = vld [vmem:[#allocation10_spill] sm:$0xff] }
 0x1c1   : > { %v1304_v56 = vpack.c.bf16 %v1264_v58, %v1260_v20  ;;  %v1269_v63 = vmul.f32 %v1205_v17, %v3634_v62  ;;  %v1273_v34 = vmul.f32 %v1209_v22, %v3197_v14  ;;  %v1144_v51 = vadd.f32 1.0, %v3279_v49  ;;  %v3642_v22 = vld [vmem:[#allocation5_spill] sm:$0xff] }
 0x1c2   : > { %v1306_v7 = vpack.c.bf16 %v1266_v26, %v1262_v43  ;;  %v1211_v29 = vmul.f32 0.5, %v1147_v30  ;;  %v1271_v39 = vmul.f32 %v1207_v8, %v3169_v24  ;;  %v1204_v21 = vmul.f32 0.5, %v1140_v50  ;;  %v3423_v62 = vld [vmem:[%s3471_s4] ss:$0 sm:$0xff] }
 0x1c3   : > { %v1142_v0 = vadd.f32 1.0, %v3635_v28  ;;  %v1146_v42 = vadd.f32 1.0, %v3636_v41  ;;  %v1309_v25 = vpack.c.bf16 %v1273_v34, %v1269_v63  ;;  %v1208_v35 = vmul.f32 0.5, %v1144_v51 }
 0x1c4   : > { %v1275_v16 = vmul.f32 %v1211_v29, %v3637_v52  ;;  %v1149_v48 = vadd.f32 1.0, %v3345_v33  ;;  %v1268_v2 = vmul.f32 %v1204_v21, %v3638_v55  ;;  %v1153_v49 = vadd.f32 1.0, %v3363_v3 }
 0x1c5   : > { %1652 = vmatmul.mubr.bf16.gmra.mrb[52].mxu0 %v1304_v56  ;;  %v1206_v14 = vmul.f32 0.5, %v1142_v0  ;;  %v1210_v47 = vmul.f32 0.5, %v1146_v42  ;;  %v1272_v38 = vmul.f32 %v1208_v35, %v3639_v18  ;;  %v1151_v61 = vadd.f32 1.0, %v3350_v46 }
 0x1c6   : > { %1749 = vmatmul.mubr.bf16.gmra.mrb[52].mxu1 %v1306_v7  ;;  %1659 = vmatprep.mubr.bf16.mxu0 %v1309_v25  ;;  %v1311_v24 = vpack.c.bf16 %v1275_v16, %v1271_v39  ;;  %v1213_v5 = vmul.f32 0.5, %v1149_v48  ;;  %v1217_v33 = vmul.f32 0.5, %v1153_v49  ;;  %v1155_v53 = vadd.f32 1.0, %v3367_v59 }
 0x1c7   : > { %v1270_v13 = vmul.f32 %v1206_v14, %v3640_v57  ;;  %v1274_v15 = vmul.f32 %v1210_v47, %v3641_v27  ;;  %v1308_v20 = vpack.c.bf16 %v1272_v38, %v1268_v2  ;;  %v1215_v3 = vmul.f32 0.5, %v1151_v61 }
 0x1c8   : > { %1756 = vmatprep.mubr.bf16.mxu1 %v1311_v24  ;;  %v1277_v44 = vmul.f32 %v1213_v5, %v3258_v9  ;;  %v1148_v54 = vadd.f32 1.0, %v3337_v37  ;;  %v1281_v36 = vmul.f32 %v1217_v33, %v3295_v4  ;;  %v1219_v6 = vmul.f32 0.5, %v1155_v53 }
 0x1c9   : > { %v1310_v45 = vpack.c.bf16 %v1274_v15, %v1270_v13  ;;  %v1152_v46 = vadd.f32 1.0, %v3354_v12  ;;  %v1150_v17 = vadd.f32 1.0, %v3341_v10  ;;  %v1154_v1 = vadd.f32 1.0, %v3358_v19  ;;  %v3643_v12 = vld [vmem:[#allocation8_spill] sm:$0xff] }
 0x1ca   : > { %v1212_v58 = vmul.f32 0.5, %v1148_v54  ;;  %v1313_v32 = vpack.c.bf16 %v1281_v36, %v1277_v44  ;;  %v1279_v59 = vmul.f32 %v1215_v3, %v3268_v40  ;;  %v1283_v43 = vmul.f32 %v1219_v6, %v3304_v11 }
 0x1cb   : > { %v1216_v9 = vmul.f32 0.5, %v1152_v46  ;;  %v1214_v23 = vmul.f32 0.5, %v1150_v17  ;;  %v1218_v26 = vmul.f32 0.5, %v1154_v1 }
 0x1cc   : > { %v1315_v37 = vpack.c.bf16 %v1283_v43, %v1279_v59  ;;  %v1276_v4 = vmul.f32 %v1212_v58, %v3642_v22 }
 0x1cd   : > { %1660 = vmatmul.mubr.bf16.gmra.mrb[56].mxu0 %v1308_v20  ;;  %v1280_v30 = vmul.f32 %v1216_v9, %v3277_v31  ;;  %v1278_v10 = vmul.f32 %v1214_v23, %v3643_v12  ;;  %v1282_v19 = vmul.f32 %v1218_v26, %v3286_v60 }
 0x1ce   : > { %1757 = vmatmul.mubr.bf16.gmra.mrb[56].mxu1 %v1310_v45  ;;  %1667 = vmatprep.mubr.bf16.mxu0 %v1313_v32 }
 0x1cf   : > { %1764 = vmatprep.mubr.bf16.mxu1 %v1315_v37  ;;  %v1312_v56 = vpack.c.bf16 %v1280_v30, %v1276_v4  ;;  %v1314_v40 = vpack.c.bf16 %v1282_v19, %v1278_v10 }
 0x1d5   : > { %1668 = vmatmul.mubr.bf16.gmra.mrb[60].mxu0 %v1312_v56 }
 0x1d6   : > { %1765 = vmatmul.mubr.bf16.gmra.mrb[60].mxu1 %v1314_v40 }
 0x247   : > { %v1951_v11 = vpop.f32.mrb[32].mxu0 }
 0x248   : > { %v1952_v63 = vpop.f32.mrb[33].mxu0 }
 0x249   : > { %v1953_v31 = vadd.f32 %v1952_v63, %v1951_v11  ;;  %v1954_v8 = vpop.f32.mrb[34].mxu0 }
 0x24a   : > { %v1955_v50 = vpop.f32.mrb[35].mxu0 }
 0x24b   : > { %v2015_v7 = vpop.f32.mrb[32].mxu1  ;;  %v1614_v34 = vadd.f32 %v1953_v31, %v3423_v62  ;;  %v1956_v60 = vadd.f32 %v1955_v50, %v1954_v8 }
 0x24c   : > { %v2016_v29 = vpop.f32.mrb[33].mxu1 }
 0x24d   : > { %v2017_v51 = vadd.f32 %v2016_v29, %v2015_v7  ;;  %v2018_v39 = vpop.f32.mrb[34].mxu1  ;;  %v1617_v21 = vadd.f32 %v1956_v60, %v3423_v62 }
 0x24e   : > { %v2019_v28 = vpop.f32.mrb[35].mxu1 }
 0x24f   : > { %v1711_v0 = vadd.f32 %v2017_v51, %v1614_v34  ;;  %v2020_v41 = vadd.f32 %v2019_v28, %v2018_v39 }
 0x251   : > { %1773 = vst [vmem:[%s3432_s21] sm:$0xff] %v1711_v0  ;;  %v1714_v42 = vadd.f32 %v2020_v41, %v1617_v21 }
 0x253   : > { %1774 = vst [vmem:[%s3432_s21 + $0x8] sm:$0xff] %v1714_v42 }
 0x25d   : > { %v1957_v25 = vpop.f32.mrb[36].mxu0 }
 0x25e   : > { %v1958_v52 = vpop.f32.mrb[37].mxu0 }
 0x25f   : > { %v2021_v16 = vpop.f32.mrb[36].mxu1  ;;  %v1959_v35 = vadd.f32 %v1958_v52, %v1957_v25  ;;  %v1960_v48 = vpop.f32.mrb[38].mxu0 }
 0x260   : > { %v2022_v55 = vpop.f32.mrb[37].mxu1  ;;  %v1961_v2 = vpop.f32.mrb[39].mxu0 }
 0x261   : > { %v1622_v14 = vadd.f32 %v1959_v35, %v3423_v62  ;;  %v2023_v47 = vadd.f32 %v2022_v55, %v2021_v16  ;;  %v2024_v49 = vpop.f32.mrb[38].mxu1  ;;  %v1962_v24 = vadd.f32 %v1961_v2, %v1960_v48 }
 0x262   : > { %v2025_v18 = vpop.f32.mrb[39].mxu1 }
 0x263   : > { %v1719_v38 = vadd.f32 %v2023_v47, %v1622_v14  ;;  %v1625_v5 = vadd.f32 %v1962_v24, %v3423_v62  ;;  %v2026_v61 = vadd.f32 %v2025_v18, %v2024_v49 }
 0x265   : > { %1775 = vst [vmem:[%s3432_s21 + $0x10] sm:$0xff] %v1719_v38  ;;  %v1722_v57 = vadd.f32 %v2026_v61, %v1625_v5 }
 0x267   : > { %1776 = vst [vmem:[%s3432_s21 + $0x18] sm:$0xff] %v1722_v57 }
 0x273   : > { %v1963_v13 = vpop.f32.mrb[40].mxu0 }
 0x274   : > { %v2027_v27 = vpop.f32.mrb[40].mxu1  ;;  %v1964_v15 = vpop.f32.mrb[41].mxu0 }
 0x275   : > { %v1965_v33 = vadd.f32 %v1964_v15, %v1963_v13  ;;  %v2028_v53 = vpop.f32.mrb[41].mxu1  ;;  %v1966_v20 = vpop.f32.mrb[42].mxu0 }
 0x276   : > { %v2029_v44 = vadd.f32 %v2028_v53, %v2027_v27  ;;  %v2030_v3 = vpop.f32.mrb[42].mxu1  ;;  %v1967_v54 = vpop.f32.mrb[43].mxu0 }
 0x277   : > { %v1630_v45 = vadd.f32 %v1965_v33, %v3423_v62  ;;  %v1968_v36 = vadd.f32 %v1967_v54, %v1966_v20  ;;  %v2031_v6 = vpop.f32.mrb[43].mxu1 }
 0x278   : > { %v2032_v46 = vadd.f32 %v2031_v6, %v2030_v3 }
 0x279   : > { %v1727_v58 = vadd.f32 %v2029_v44, %v1630_v45  ;;  %v1633_v17 = vadd.f32 %v1968_v36, %v3423_v62 }
 0x27b   : > { %1777 = vst [vmem:[%s3432_s21 + $0x20] sm:$0xff] %v1727_v58  ;;  %v1730_v1 = vadd.f32 %v2032_v46, %v1633_v17 }
 0x27d   : > { %1778 = vst [vmem:[%s3432_s21 + $0x28] sm:$0xff] %v1730_v1 }
 0x288   : > { %v1969_v32 = vpop.f32.mrb[44].mxu0 }
 0x289   : > { %v2033_v59 = vpop.f32.mrb[44].mxu1  ;;  %v1970_v43 = vpop.f32.mrb[45].mxu0 }
 0x28a   : > { %v1971_v9 = vadd.f32 %v1970_v43, %v1969_v32  ;;  %v2034_v23 = vpop.f32.mrb[45].mxu1  ;;  %v1972_v26 = vpop.f32.mrb[46].mxu0 }
 0x28b   : > { %v2035_v37 = vadd.f32 %v2034_v23, %v2033_v59  ;;  %v2036_v22 = vpop.f32.mrb[46].mxu1  ;;  %v1973_v4 = vpop.f32.mrb[47].mxu0 }
 0x28c   : > { %v1638_v30 = vadd.f32 %v1971_v9, %v3423_v62  ;;  %v1974_v12 = vadd.f32 %v1973_v4, %v1972_v26  ;;  %v2037_v10 = vpop.f32.mrb[47].mxu1 }
 0x28d   : > { %v2038_v19 = vadd.f32 %v2037_v10, %v2036_v22 }
 0x28e   : > { %v1735_v56 = vadd.f32 %v2035_v37, %v1638_v30  ;;  %v1641_v40 = vadd.f32 %v1974_v12, %v3423_v62 }
 0x290   : > { %1779 = vst [vmem:[%s3432_s21 + $0x30] sm:$0xff] %v1735_v56  ;;  %v1738_v11 = vadd.f32 %v2038_v19, %v1641_v40  ;;  %v1975_v63 = vpop.f32.mrb[48].mxu0 }
 0x291   : > { %v2039_v31 = vpop.f32.mrb[48].mxu1  ;;  %v1976_v8 = vpop.f32.mrb[49].mxu0 }
 0x292   : > { %1780 = vst [vmem:[%s3432_s21 + $0x38] sm:$0xff] %v1738_v11  ;;  %v1977_v50 = vadd.f32 %v1976_v8, %v1975_v63  ;;  %v2040_v7 = vpop.f32.mrb[49].mxu1  ;;  %v1978_v34 = vpop.f32.mrb[50].mxu0 }
 0x293   : > { %v2041_v60 = vadd.f32 %v2040_v7, %v2039_v31  ;;  %v2042_v29 = vpop.f32.mrb[50].mxu1  ;;  %v1979_v51 = vpop.f32.mrb[51].mxu0 }
 0x294   : > { %v1646_v39 = vadd.f32 %v1977_v50, %v3423_v62  ;;  %v1980_v21 = vadd.f32 %v1979_v51, %v1978_v34  ;;  %v2043_v28 = vpop.f32.mrb[51].mxu1 }
 0x295   : > { %v2044_v0 = vadd.f32 %v2043_v28, %v2042_v29 }
 0x296   : > { %v1743_v41 = vadd.f32 %v2041_v60, %v1646_v39  ;;  %v1649_v42 = vadd.f32 %v1980_v21, %v3423_v62 }
 0x298   : > { %1781 = vst [vmem:[%s3432_s21 + $0x40] sm:$0xff] %v1743_v41  ;;  %v1746_v25 = vadd.f32 %v2044_v0, %v1649_v42  ;;  %v1981_v52 = vpop.f32.mrb[52].mxu0 }
 0x299   : > { %v2045_v16 = vpop.f32.mrb[52].mxu1  ;;  %v1982_v35 = vpop.f32.mrb[53].mxu0 }
 0x29a   : > { %1782 = vst [vmem:[%s3432_s21 + $0x48] sm:$0xff] %v1746_v25  ;;  %v1983_v48 = vadd.f32 %v1982_v35, %v1981_v52  ;;  %v2046_v55 = vpop.f32.mrb[53].mxu1  ;;  %v1984_v2 = vpop.f32.mrb[54].mxu0 }
 0x29b   : > { %v2047_v14 = vadd.f32 %v2046_v55, %v2045_v16  ;;  %v2048_v47 = vpop.f32.mrb[54].mxu1  ;;  %v1985_v49 = vpop.f32.mrb[55].mxu0 }
 0x29c   : > { %v1654_v24 = vadd.f32 %v1983_v48, %v3423_v62  ;;  %v1986_v18 = vadd.f32 %v1985_v49, %v1984_v2  ;;  %v2049_v38 = vpop.f32.mrb[55].mxu1 }
 0x29d   : > { %v2050_v5 = vadd.f32 %v2049_v38, %v2048_v47 }
 0x29e   : > { %v1751_v61 = vadd.f32 %v2047_v14, %v1654_v24  ;;  %v1657_v57 = vadd.f32 %v1986_v18, %v3423_v62 }
 0x2a0   : > { %1783 = vst [vmem:[%s3432_s21 + $0x50] sm:$0xff] %v1751_v61  ;;  %v1754_v13 = vadd.f32 %v2050_v5, %v1657_v57  ;;  %v1987_v27 = vpop.f32.mrb[56].mxu0 }
 0x2a1   : > { %v2051_v15 = vpop.f32.mrb[56].mxu1  ;;  %v1988_v33 = vpop.f32.mrb[57].mxu0 }
 0x2a2   : > { %1784 = vst [vmem:[%s3432_s21 + $0x58] sm:$0xff] %v1754_v13  ;;  %v1989_v53 = vadd.f32 %v1988_v33, %v1987_v27  ;;  %v2052_v20 = vpop.f32.mrb[57].mxu1  ;;  %v1990_v44 = vpop.f32.mrb[58].mxu0 }
 0x2a3   : > { %v2053_v3 = vadd.f32 %v2052_v20, %v2051_v15  ;;  %v2054_v54 = vpop.f32.mrb[58].mxu1  ;;  %v1991_v45 = vpop.f32.mrb[59].mxu0 }
 0x2a4   : > { %v1662_v36 = vadd.f32 %v1989_v53, %v3423_v62  ;;  %v1992_v6 = vadd.f32 %v1991_v45, %v1990_v44  ;;  %v2055_v46 = vpop.f32.mrb[59].mxu1 }
 0x2a5   : > { %v2056_v58 = vadd.f32 %v2055_v46, %v2054_v54 }
 0x2a6   : > { %v1759_v17 = vadd.f32 %v2053_v3, %v1662_v36  ;;  %v1665_v1 = vadd.f32 %v1992_v6, %v3423_v62 }
 0x2a8   : > { %1785 = vst [vmem:[%s3432_s21 + $0x60] sm:$0xff] %v1759_v17  ;;  %v1762_v32 = vadd.f32 %v2056_v58, %v1665_v1  ;;  %v1993_v59 = vpop.f32.mrb[60].mxu0 }
 0x2a9   : > { %v2057_v43 = vpop.f32.mrb[60].mxu1  ;;  %v1994_v9 = vpop.f32.mrb[61].mxu0 }
 0x2aa   : > { %1786 = vst [vmem:[%s3432_s21 + $0x68] sm:$0xff] %v1762_v32  ;;  %v1995_v23 = vadd.f32 %v1994_v9, %v1993_v59  ;;  %v2058_v26 = vpop.f32.mrb[61].mxu1  ;;  %v1996_v37 = vpop.f32.mrb[62].mxu0 }
 0x2ab   : > { %v2059_v22 = vadd.f32 %v2058_v26, %v2057_v43  ;;  %v2060_v4 = vpop.f32.mrb[62].mxu1  ;;  %v1997_v30 = vpop.f32.mrb[63].mxu0 }
 0x2ac   : > { %v1670_v12 = vadd.f32 %v1995_v23, %v3423_v62  ;;  %v1998_v10 = vadd.f32 %v1997_v30, %v1996_v37  ;;  %v2061_v19 = vpop.f32.mrb[63].mxu1 }
 0x2ad   : > { %v2062_v56 = vadd.f32 %v2061_v19, %v2060_v4 }
 0x2ae   : > { %v1767_v40 = vadd.f32 %v2059_v22, %v1670_v12  ;;  %v1673_v11 = vadd.f32 %v1998_v10, %v3423_v62 }
 0x2b0   : > { %1787 = vst [vmem:[%s3432_s21 + $0x70] sm:$0xff] %v1767_v40  ;;  %v1770_v63 = vadd.f32 %v2062_v56, %v1673_v11 }
 0x2b2   : > { %1788 = vst [vmem:[%s3432_s21 + $0x78] sm:$0xff] %v1770_v63 }
 0x2b3 PF: > { %s16_s18 = sadd.s32 1, %s2331_s18  }
 0x2b4   : > { %p13_p3 = scmp.ge.s32.totalorder %s16_s18, 4  }
 0x2b6   :  { %15 = sbr.rel (!%p13_p3) target bundleno = 1 (0x1), region = 75 }
 0x2bd   :  { %1811 = vsyncpa [#allocation3], 1 }
 0x2be   :  { %1813 = vsyncpa [#allocation3 + $0x1], 1 }

</bundles_post_ra>
